<compile_context>
chip_gen: v7x
topology: tpu7x:2x2x1
jax: 0.10.0
libtpu: 0.0.40
codegen_flags: <defaults>
</compile_context>

<pallas_src>
import functools

import jax
import jax.numpy as jnp
from jax.experimental import pallas as pl
from jax.experimental.pallas import tpu as pltpu

# ---------------- configuration (reference module relied on globals) --------
SR = 16000.0
N_FFT = 256
HOP = 128                       # == lane width; frames are pairs of 128-chunks
NF = 128                        # onesided bins kept (Nyquist bin has zero band weight)
BANDS = ((0.0, 500.0), (500.0, 1000.0), (1000.0, 2000.0),
         (2000.0, 4000.0), (4000.0, 8000.0))                  # Hz
NB = len(BANDS)
K_CONV = 9                      # Conv1d kernel size
PAD = K_CONV // 2
# TODO(synk): the wrapped `model` is undefined in the original source; it is
# instantiated here as a fixed Conv1d(1,1,9,padding=4) enhancement filter.


# ---------------- fused kernel -------------------------------------------------
def _fused_band_kernel(x_ref, gcat_ref, gedge_ref, bias_ref, bandw_ref, o_ref, *, C):
    # x_ref:     (BB, C, 128) f32   raw input signal, one 128-sample chunk per slot
    # gcat_ref:  (128, 1024)  bf16  conv+Hann+rDFT folded, 4 chunk-shift blocks
    # gedge_ref: (128, 1024)  bf16  [GF0 | GF1 | GB0 | GB1] reflect-edge matrices
    # bias_ref:  (8, 256)     f32   rows 0/1/2 = interior / front / back bias spectra
    # bandw_ref: (128, 128)   f32   band-mean weights (5 real columns, lane padded)
    # o_ref:     (1, BB, 128) f32   lane-dense padded band features
    BB = x_ref.shape[0]
    xall = x_ref[...]                                     # (BB, C, 128) f32
    xb = xall.astype(jnp.bfloat16)                        # cast exactly once
    bias = bias_ref[...]

    # ---- interior frames f = 1..C-1 (frame f spans x chunks f-2..f+1) ----------
    rows = xb.reshape(BB * C, HOP)                        # collapse leading dims
    p = jnp.dot(rows, gcat_ref[...],
                preferred_element_type=jnp.float32)       # (BB*C, 1024) single MXU pass
    p = p.reshape(BB, C, 4 * 2 * NF)
    p0 = p[..., 0 * 2 * NF:1 * 2 * NF]
    p1 = p[..., 1 * 2 * NF:2 * 2 * NF]
    p2 = p[..., 2 * 2 * NF:3 * 2 * NF]
    p3 = p[..., 3 * 2 * NF:4 * 2 * NF]
    z1 = jnp.zeros((BB, 1, 2 * NF), jnp.float32)
    z2 = jnp.zeros((BB, 2, 2 * NF), jnp.float32)
    # slot s (= frame s+1): spec = p0[s-1] + p1[s] + p2[s+1] + p3[s+2]; the zero
    # fill at the chunk-axis ends is exactly the zero padding seen by frames 1, C-1.
    q = (jnp.concatenate([z1, p0[:, :C - 1, :]], axis=1)
         + p1
         + jnp.concatenate([p2[:, 1:, :], z1], axis=1)
         + jnp.concatenate([p3[:, 2:, :], z2], axis=1)
         + bias[0:1, :].reshape(1, 1, 2 * NF))
    re = q[..., :NF]
    im = q[..., NF:]
    mag = jnp.sqrt(re * re + im * im)                     # (BB, C, 128) f32 (EUP rsqrt path)
    msum = jnp.sum(mag[:, :C - 1, :], axis=1)             # slot C-1 is junk -> dropped

    # ---- edge frames 0 and F-1 (reflect padding of the *enhanced* signal) ------
    gedge = gedge_ref[...]
    h0 = xb[:, 0, :]
    h1 = xb[:, 1, :]
    t0 = xb[:, C - 2, :]
    t1 = xb[:, C - 1, :]
    spec_f = (jnp.dot(h0, gedge[:, 0 * 2 * NF:1 * 2 * NF], preferred_element_type=jnp.float32)
              + jnp.dot(h1, gedge[:, 1 * 2 * NF:2 * 2 * NF], preferred_element_type=jnp.float32)
              + bias[1:2, :])
    spec_b = (jnp.dot(t0, gedge[:, 2 * 2 * NF:3 * 2 * NF], preferred_element_type=jnp.float32)
              + jnp.dot(t1, gedge[:, 3 * 2 * NF:4 * 2 * NF], preferred_element_type=jnp.float32)
              + bias[2:3, :])
    mf = jnp.sqrt(spec_f[:, :NF] * spec_f[:, :NF] + spec_f[:, NF:] * spec_f[:, NF:])
    mb = jnp.sqrt(spec_b[:, :NF] * spec_b[:, :NF] + spec_b[:, NF:] * spec_b[:, NF:])

    total = msum + mf + mb                                # (BB, 128) per-batch |STFT| sums
    o_ref[0] = jnp.dot(total, bandw_ref[...], preferred_element_type=jnp.float32)


# ---------------- host-side constants (conv folded into the DFT) ---------------
def _make_constants(conv_w, conv_b, C):
    """Fold Conv1d(1,1,K,pad) + periodic Hann + onesided rDFT into MXU matrices."""
    n = jnp.arange(N_FFT, dtype=jnp.float32)
    window = 0.5 - 0.5 * jnp.cos(2.0 * jnp.pi * n / N_FFT)          # periodic Hann
    f = jnp.arange(NF, dtype=jnp.float32)                           # bins 0..127
    ang = 2.0 * jnp.pi * n[:, None] * f[None, :] / N_FFT
    wd = jnp.concatenate([jnp.cos(ang), -jnp.sin(ang)], axis=1) * window[:, None]  # (256,256)

    # Interior frames: G[m,:] = sum_k w[k] * wd[m-k,:]  (Toeplitz(w) @ (win*DFT)).
    # Frame f samples are e[(f-1)*128 + n]; x index = (f-1)*128 - PAD + m, m = n + k.
    g = jnp.zeros((N_FFT + K_CONV - 1, 2 * NF), jnp.float32)
    for k in range(K_CONV):
        g = g.at[k:k + N_FFT].add(conv_w[k] * wd)
    g0 = jnp.zeros((HOP, 2 * NF), jnp.float32).at[HOP - PAD:].set(g[:PAD])          # chunk f-2
    g1 = g[PAD:PAD + HOP]                                                            # chunk f-1
    g2 = g[PAD + HOP:PAD + 2 * HOP]                                                  # chunk f
    g3 = jnp.zeros((HOP, 2 * NF), jnp.float32).at[:K_CONV - 1 - PAD].set(g[PAD + 2 * HOP:])
    gcat = jnp.concatenate([g0, g1, g2, g3], axis=1)                 # (128, 1024)
    bias_int = conv_b[0] * jnp.sum(wd, axis=0)

    # Frame 0 (front reflect): A[t,:] = coefficient of e[t], t = 0..128.
    a = jnp.zeros((129, 2 * NF), jnp.float32)
    a = a.at[0].set(wd[128])
    a = a.at[128].set(wd[0])
    t = jnp.arange(1, 128)
    a = a.at[1:128].set(wd[128 + t] + wd[128 - t])
    n_front = 129 + K_CONV - 1 - PAD                                 # x[0..132]
    gf = jnp.zeros((n_front, 2 * NF), jnp.float32)
    for k in range(K_CONV):
        off = k - PAD
        if off >= 0:
            gf = gf.at[off:off + 129].add(conv_w[k] * a)
        else:
            gf = gf.at[:129 + off].add(conv_w[k] * a[-off:])
    gf0 = gf[:HOP]
    gf1 = jnp.zeros((HOP, 2 * NF), jnp.float32).at[:n_front - HOP].set(gf[HOP:])
    bias_front = conv_b[0] * jnp.sum(a, axis=0)

    # Frame F-1 (back reflect): Bm[s,:] = coefficient of e[T-129+s], s = 0..128.
    bm = jnp.zeros((129, 2 * NF), jnp.float32)
    bm = bm.at[0].set(wd[255])
    bm = bm.at[128].set(wd[127])
    s = jnp.arange(1, 128)
    bm = bm.at[1:128].set(wd[s - 1] + wd[255 - s])
    gb = jnp.zeros((2 * HOP, 2 * NF), jnp.float32)                   # coeff of x[T-256..T-1]
    for k in range(K_CONV):
        start = 2 * HOP - 129 - PAD + k
        length = min(129, 2 * HOP - start)                           # clip conv zero padding
        gb = gb.at[start:start + length].add(conv_w[k] * bm[:length])
    gb0 = gb[:HOP]
    gb1 = gb[HOP:]
    bias_back = conv_b[0] * jnp.sum(bm, axis=0)

    gedge = jnp.concatenate([gf0, gf1, gb0, gb1], axis=1)            # (128, 1024)
    bias_pack = jnp.zeros((8, 2 * NF), jnp.float32)
    bias_pack = bias_pack.at[0].set(bias_int).at[1].set(bias_front).at[2].set(bias_back)

    # Band weights: mean over (bins in band, F = C+1 frames); lane padded to 128.
    freqs = f * SR / N_FFT
    cols = []
    for lo, hi in BANDS:
        m = ((freqs >= lo) & (freqs < hi)).astype(jnp.float32)
        cols.append(m / (jnp.sum(m) * (C + 1)))
    band_w = jnp.pad(jnp.stack(cols, axis=1), ((0, 0), (0, HOP - NB)))   # (128, 128)
    return gcat.astype(jnp.bfloat16), gedge.astype(jnp.bfloat16), bias_pack, band_w


def _pick_batch_block(B, C):
    per_row_bytes = C * HOP * 4 * 24            # x, P, Q, mag + pipeline slack
    cap = max(1, (12 << 20) // per_row_bytes)   # keep per-step VMEM well under v7x's 64 MiB
    target = max(1, 256 // max(C, 1))           # aim M = BB*C ~ 256 (v6e/v7x 256-wide MXU)
    limit = max(1, min(cap, target))
    divs = [d for d in range(1, B + 1) if B % d == 0 and d <= limit] or [1]
    if B >= 2:
        two = [d for d in divs if B // d >= 2]  # >=2 grid steps -> both v7x TensorCores busy
        if two:
            return max(two)
    return max(divs)


# ---------------- wrapper -------------------------------------------------------
def band_feature_model_forward(x, conv_w, conv_b):
    """x: (B, 1, T) float32 -> (B, NB) band features of the conv-enhanced signal."""
    B, ch, T = x.shape
    assert ch == 1 and T % HOP == 0
    C = T // HOP
    assert C >= 4, "need at least 4 hops of signal"
    # TODO(synk): clips with T >~ 1M samples should add a time-tiled grid axis with a
    # one-chunk halo to bound VMEM on v7x; unnecessary at these shapes.
    BB = _pick_batch_block(B, C)
    G = B // BB
    x3 = x.reshape(B, C, HOP).astype(jnp.float32)         # free bitcast reshape, no pad
    gcat, gedge, bias_pack, band_w = _make_constants(conv_w, conv_b, C)
    kernel = functools.partial(_fused_band_kernel, C=C)
    out = pl.pallas_call(
        kernel,
        out_shape=jax.ShapeDtypeStruct((G, BB, HOP), jnp.float32),
        grid=(G,),
        in_specs=[
            pl.BlockSpec((BB, C, HOP), lambda g: (g, 0, 0)),     # signal block (only HBM read)
            pl.BlockSpec((HOP, 8 * NF), lambda g: (0, 0)),       # folded conv+win+DFT (resident)
            pl.BlockSpec((HOP, 8 * NF), lambda g: (0, 0)),       # edge-frame matrices (resident)
            pl.BlockSpec((8, 2 * NF), lambda g: (0, 0)),         # bias spectra
            pl.BlockSpec((NF, HOP), lambda g: (0, 0)),           # band weights
        ],
        out_specs=pl.BlockSpec((1, BB, HOP), lambda g: (g, 0, 0)),
        compiler_params=pltpu.CompilerParams(dimension_semantics=("parallel",)),
    )(x3, gcat, gedge, bias_pack, band_w)
    return out.reshape(B, HOP)[:, :NB]


# ---------------- pure-JAX reference for a numerical sanity check --------------
def reference_forward(x, conv_w, conv_b):
    B, _, T = x.shape
    xb = x.reshape(B, T).astype(jnp.float32)
    xp = jnp.pad(xb, ((0, 0), (PAD, PAD)))
    enh = conv_b[0] + sum(conv_w[k] * xp[:, k:k + T] for k in range(K_CONV))
    spad = jnp.pad(enh, ((0, 0), (N_FFT // 2, N_FFT // 2)), mode="reflect")
    F = 1 + T // HOP
    idx = jnp.arange(F)[:, None] * HOP + jnp.arange(N_FFT)[None, :]
    frames = spad[:, idx]                                          # (B, F, N_FFT)
    n = jnp.arange(N_FFT, dtype=jnp.float32)
    window = 0.5 - 0.5 * jnp.cos(2.0 * jnp.pi * n / N_FFT)
    nfull = N_FFT // 2 + 1                                         # all 129 onesided bins
    k = jnp.arange(nfull, dtype=jnp.float32)
    ang = 2.0 * jnp.pi * n[:, None] * k[None, :] / N_FFT
    hi = jax.lax.Precision.HIGHEST
    wf = frames * window
    re = jnp.einsum("bfn,nk->bfk", wf, jnp.cos(ang), precision=hi)
    im = jnp.einsum("bfn,nk->bfk", wf, -jnp.sin(ang), precision=hi)
    mag = jnp.sqrt(re * re + im * im)                              # (B, F, 129)
    freqs = k * SR / N_FFT
    feats = []
    for lo, hb in BANDS:
        m = (freqs >= lo) & (freqs < hb)
        feats.append(jnp.sum(jnp.where(m, mag, 0.0), axis=(1, 2)) / (jnp.sum(m) * F))
    return jnp.stack(feats, axis=1)


if __name__ == "__main__":
    B, T = 4, 2048
    key = jax.random.PRNGKey(0)
    kx, kw, kb = jax.random.split(key, 3)
    x = jax.random.normal(kx, (B, 1, T), dtype=jnp.float32)

    # Deterministic "enhancement model": Conv1d(1,1,9,padding=4), noisy near-identity.
    conv_w = 0.1 * jax.random.normal(kw, (K_CONV,), dtype=jnp.float32)
    conv_w = conv_w.at[K_CONV // 2].add(1.0)
    conv_b = 0.01 * jax.random.normal(kb, (1,), dtype=jnp.float32)

    fwd = jax.jit(band_feature_model_forward)
    out = jax.block_until_ready(fwd(x, conv_w, conv_b))
    ref = reference_forward(x, conv_w, conv_b)

    assert out.shape == (B, NB), out.shape
    assert bool(jnp.all(jnp.isfinite(out)))
    assert bool(jnp.allclose(out, ref, rtol=2e-2, atol=2e-3)), (out, ref)
    print("KERNEL_OK")
</pallas_src>

<mosaic_0001>
module attributes {stable_mosaic.version = 11 : i64} {
  func.func @_fused_band_kernel(%arg0: i32, %arg1: memref<2x16x128xf32, #tpu.memory_space<vmem>>, %arg2: memref<128x1024xbf16, #tpu.memory_space<vmem>>, %arg3: memref<128x1024xbf16, #tpu.memory_space<vmem>>, %arg4: memref<8x256xf32, #tpu.memory_space<vmem>>, %arg5: memref<128x128xf32, #tpu.memory_space<vmem>>, %arg6: memref<1x2x128xf32, #tpu.memory_space<vmem>>) attributes {dimension_semantics = [#tpu.dimension_semantics<parallel>], iteration_bounds = array<i64: 2>, scalar_prefetch = 0 : i64, scratch_operands = 0 : i64, tpu.core_type = #tpu.core_type<tc>, window_params = [{transform_indices = @transform_0, window_bounds = array<i64: 2, 16, 128>}, {pipeline_mode = #tpu.pipeline_mode<synchronous>, transform_indices = @transform_1, window_bounds = array<i64: 128, 1024>}, {pipeline_mode = #tpu.pipeline_mode<synchronous>, transform_indices = @transform_2, window_bounds = array<i64: 128, 1024>}, {pipeline_mode = #tpu.pipeline_mode<synchronous>, transform_indices = @transform_3, window_bounds = array<i64: 8, 256>}, {pipeline_mode = #tpu.pipeline_mode<synchronous>, transform_indices = @transform_4, window_bounds = array<i64: 128, 128>}, {transform_indices = @transform_5, window_bounds = array<i64: 1, 2, 128>}]} {
    %c0 = arith.constant 0 : index
    %c0_0 = arith.constant 0 : index
    %c0_1 = arith.constant 0 : index
    %0 = vector.load %arg1[%c0, %c0_0, %c0_1] : memref<2x16x128xf32, #tpu.memory_space<vmem>>, vector<2x16x128xf32>
    %1 = arith.truncf %0 : vector<2x16x128xf32> to vector<2x16x128xbf16>
    %c0_2 = arith.constant 0 : index
    %c0_3 = arith.constant 0 : index
    %2 = vector.load %arg4[%c0_2, %c0_3] : memref<8x256xf32, #tpu.memory_space<vmem>>, vector<8x256xf32>
    %3 = vector.shape_cast %1 : vector<2x16x128xbf16> to vector<32x128xbf16>
    %c0_4 = arith.constant 0 : index
    %c0_5 = arith.constant 0 : index
    %4 = vector.load %arg2[%c0_4, %c0_5] : memref<128x1024xbf16, #tpu.memory_space<vmem>>, vector<128x1024xbf16>
    %cst = arith.constant dense<0.000000e+00> : vector<32x1024xf32>
    %5 = tpu.matmul %3, %4, %cst {dimension_numbers = #tpu.dot_dimension_numbers<[1], [0], [0], [1], [0, 0, 1, 1], [], []>} : vector<32x128xbf16>, vector<128x1024xbf16>, vector<32x1024xf32> -> vector<32x1024xf32>
    %6 = vector.shape_cast %5 : vector<32x1024xf32> to vector<2x16x1024xf32>
    %7 = vector.extract_strided_slice %6 {offsets = [0, 0, 0], sizes = [2, 16, 256], strides = [1, 1, 1]} : vector<2x16x1024xf32> to vector<2x16x256xf32>
    %8 = vector.extract_strided_slice %6 {offsets = [0, 0, 256], sizes = [2, 16, 256], strides = [1, 1, 1]} : vector<2x16x1024xf32> to vector<2x16x256xf32>
    %9 = vector.extract_strided_slice %6 {offsets = [0, 0, 512], sizes = [2, 16, 256], strides = [1, 1, 1]} : vector<2x16x1024xf32> to vector<2x16x256xf32>
    %10 = vector.extract_strided_slice %6 {offsets = [0, 0, 768], sizes = [2, 16, 256], strides = [1, 1, 1]} : vector<2x16x1024xf32> to vector<2x16x256xf32>
    %cst_6 = arith.constant 0.000000e+00 : f32
    %11 = vector.broadcast %cst_6 : f32 to vector<2x1x256xf32>
    %cst_7 = arith.constant 0.000000e+00 : f32
    %12 = vector.broadcast %cst_7 : f32 to vector<2x2x256xf32>
    %13 = vector.extract_strided_slice %7 {offsets = [0, 0, 0], sizes = [2, 15, 256], strides = [1, 1, 1]} : vector<2x16x256xf32> to vector<2x15x256xf32>
    %14 = tpu.concatenate %11, %13 in 1 : vector<2x1x256xf32>, vector<2x15x256xf32> -> vector<2x16x256xf32>
    %15 = arith.addf %14, %8 : vector<2x16x256xf32>
    %16 = vector.extract_strided_slice %9 {offsets = [0, 1, 0], sizes = [2, 15, 256], strides = [1, 1, 1]} : vector<2x16x256xf32> to vector<2x15x256xf32>
    %17 = tpu.concatenate %16, %11 in 1 : vector<2x15x256xf32>, vector<2x1x256xf32> -> vector<2x16x256xf32>
    %18 = arith.addf %15, %17 : vector<2x16x256xf32>
    %19 = vector.extract_strided_slice %10 {offsets = [0, 2, 0], sizes = [2, 14, 256], strides = [1, 1, 1]} : vector<2x16x256xf32> to vector<2x14x256xf32>
    %20 = tpu.concatenate %19, %12 in 1 : vector<2x14x256xf32>, vector<2x2x256xf32> -> vector<2x16x256xf32>
    %21 = arith.addf %18, %20 : vector<2x16x256xf32>
    %22 = vector.extract_strided_slice %2 {offsets = [0, 0], sizes = [1, 256], strides = [1, 1]} : vector<8x256xf32> to vector<1x256xf32>
    %23 = vector.shape_cast %22 : vector<1x256xf32> to vector<1x1x256xf32>
    %24 = vector.broadcast %23 : vector<1x1x256xf32> to vector<2x16x256xf32>
    %25 = arith.addf %21, %24 : vector<2x16x256xf32>
    %26 = vector.extract_strided_slice %25 {offsets = [0, 0, 0], sizes = [2, 16, 128], strides = [1, 1, 1]} : vector<2x16x256xf32> to vector<2x16x128xf32>
    %27 = vector.extract_strided_slice %25 {offsets = [0, 0, 128], sizes = [2, 16, 128], strides = [1, 1, 1]} : vector<2x16x256xf32> to vector<2x16x128xf32>
    %28 = arith.mulf %26, %26 : vector<2x16x128xf32>
    %29 = arith.mulf %27, %27 : vector<2x16x128xf32>
    %30 = arith.addf %28, %29 : vector<2x16x128xf32>
    %31 = math.sqrt %30 : vector<2x16x128xf32>
    %32 = vector.extract_strided_slice %31 {offsets = [0, 0, 0], sizes = [2, 15, 128], strides = [1, 1, 1]} : vector<2x16x128xf32> to vector<2x15x128xf32>
    %cst_8 = arith.constant dense<0.000000e+00> : vector<2x128xf32>
    %33 = vector.multi_reduction <add>, %32, %cst_8 [1] : vector<2x15x128xf32> to vector<2x128xf32>
    %c0_9 = arith.constant 0 : index
    %c0_10 = arith.constant 0 : index
    %34 = vector.load %arg3[%c0_9, %c0_10] : memref<128x1024xbf16, #tpu.memory_space<vmem>>, vector<128x1024xbf16>
    %35 = vector.extract_strided_slice %1 {offsets = [0, 0, 0], sizes = [2, 1, 128], strides = [1, 1, 1]} : vector<2x16x128xbf16> to vector<2x1x128xbf16>
    %36 = vector.shape_cast %35 : vector<2x1x128xbf16> to vector<2x128xbf16>
    %37 = vector.extract_strided_slice %1 {offsets = [0, 1, 0], sizes = [2, 1, 128], strides = [1, 1, 1]} : vector<2x16x128xbf16> to vector<2x1x128xbf16>
    %38 = vector.shape_cast %37 : vector<2x1x128xbf16> to vector<2x128xbf16>
    %39 = vector.extract_strided_slice %1 {offsets = [0, 14, 0], sizes = [2, 1, 128], strides = [1, 1, 1]} : vector<2x16x128xbf16> to vector<2x1x128xbf16>
    %40 = vector.shape_cast %39 : vector<2x1x128xbf16> to vector<2x128xbf16>
    %41 = vector.extract_strided_slice %1 {offsets = [0, 15, 0], sizes = [2, 1, 128], strides = [1, 1, 1]} : vector<2x16x128xbf16> to vector<2x1x128xbf16>
    %42 = vector.shape_cast %41 : vector<2x1x128xbf16> to vector<2x128xbf16>
    %43 = vector.extract_strided_slice %34 {offsets = [0, 0], sizes = [128, 256], strides = [1, 1]} : vector<128x1024xbf16> to vector<128x256xbf16>
    %cst_11 = arith.constant dense<0.000000e+00> : vector<2x256xf32>
    %44 = tpu.matmul %36, %43, %cst_11 {dimension_numbers = #tpu.dot_dimension_numbers<[1], [0], [0], [1], [0, 0, 1, 1], [], []>} : vector<2x128xbf16>, vector<128x256xbf16>, vector<2x256xf32> -> vector<2x256xf32>
    %45 = vector.extract_strided_slice %34 {offsets = [0, 256], sizes = [128, 256], strides = [1, 1]} : vector<128x1024xbf16> to vector<128x256xbf16>
    %cst_12 = arith.constant dense<0.000000e+00> : vector<2x256xf32>
    %46 = tpu.matmul %38, %45, %cst_12 {dimension_numbers = #tpu.dot_dimension_numbers<[1], [0], [0], [1], [0, 0, 1, 1], [], []>} : vector<2x128xbf16>, vector<128x256xbf16>, vector<2x256xf32> -> vector<2x256xf32>
    %47 = arith.addf %44, %46 : vector<2x256xf32>
    %48 = vector.extract_strided_slice %2 {offsets = [1, 0], sizes = [1, 256], strides = [1, 1]} : vector<8x256xf32> to vector<1x256xf32>
    %49 = vector.broadcast %48 : vector<1x256xf32> to vector<2x256xf32>
    %50 = arith.addf %47, %49 : vector<2x256xf32>
    %51 = vector.extract_strided_slice %34 {offsets = [0, 512], sizes = [128, 256], strides = [1, 1]} : vector<128x1024xbf16> to vector<128x256xbf16>
    %cst_13 = arith.constant dense<0.000000e+00> : vector<2x256xf32>
    %52 = tpu.matmul %40, %51, %cst_13 {dimension_numbers = #tpu.dot_dimension_numbers<[1], [0], [0], [1], [0, 0, 1, 1], [], []>} : vector<2x128xbf16>, vector<128x256xbf16>, vector<2x256xf32> -> vector<2x256xf32>
    %53 = vector.extract_strided_slice %34 {offsets = [0, 768], sizes = [128, 256], strides = [1, 1]} : vector<128x1024xbf16> to vector<128x256xbf16>
    %cst_14 = arith.constant dense<0.000000e+00> : vector<2x256xf32>
    %54 = tpu.matmul %42, %53, %cst_14 {dimension_numbers = #tpu.dot_dimension_numbers<[1], [0], [0], [1], [0, 0, 1, 1], [], []>} : vector<2x128xbf16>, vector<128x256xbf16>, vector<2x256xf32> -> vector<2x256xf32>
    %55 = arith.addf %52, %54 : vector<2x256xf32>
    %56 = vector.extract_strided_slice %2 {offsets = [2, 0], sizes = [1, 256], strides = [1, 1]} : vector<8x256xf32> to vector<1x256xf32>
    %57 = vector.broadcast %56 : vector<1x256xf32> to vector<2x256xf32>
    %58 = arith.addf %55, %57 : vector<2x256xf32>
    %59 = vector.extract_strided_slice %50 {offsets = [0, 0], sizes = [2, 128], strides = [1, 1]} : vector<2x256xf32> to vector<2x128xf32>
    %60 = vector.extract_strided_slice %50 {offsets = [0, 0], sizes = [2, 128], strides = [1, 1]} : vector<2x256xf32> to vector<2x128xf32>
    %61 = arith.mulf %59, %60 : vector<2x128xf32>
    %62 = vector.extract_strided_slice %50 {offsets = [0, 128], sizes = [2, 128], strides = [1, 1]} : vector<2x256xf32> to vector<2x128xf32>
    %63 = vector.extract_strided_slice %50 {offsets = [0, 128], sizes = [2, 128], strides = [1, 1]} : vector<2x256xf32> to vector<2x128xf32>
    %64 = arith.mulf %62, %63 : vector<2x128xf32>
    %65 = arith.addf %61, %64 : vector<2x128xf32>
    %66 = math.sqrt %65 : vector<2x128xf32>
    %67 = vector.extract_strided_slice %58 {offsets = [0, 0], sizes = [2, 128], strides = [1, 1]} : vector<2x256xf32> to vector<2x128xf32>
    %68 = vector.extract_strided_slice %58 {offsets = [0, 0], sizes = [2, 128], strides = [1, 1]} : vector<2x256xf32> to vector<2x128xf32>
    %69 = arith.mulf %67, %68 : vector<2x128xf32>
    %70 = vector.extract_strided_slice %58 {offsets = [0, 128], sizes = [2, 128], strides = [1, 1]} : vector<2x256xf32> to vector<2x128xf32>
    %71 = vector.extract_strided_slice %58 {offsets = [0, 128], sizes = [2, 128], strides = [1, 1]} : vector<2x256xf32> to vector<2x128xf32>
    %72 = arith.mulf %70, %71 : vector<2x128xf32>
    %73 = arith.addf %69, %72 : vector<2x128xf32>
    %74 = math.sqrt %73 : vector<2x128xf32>
    %75 = arith.addf %33, %66 : vector<2x128xf32>
    %76 = arith.addf %75, %74 : vector<2x128xf32>
    %c0_15 = arith.constant 0 : index
    %c0_16 = arith.constant 0 : index
    %77 = vector.load %arg5[%c0_15, %c0_16] : memref<128x128xf32, #tpu.memory_space<vmem>>, vector<128x128xf32>
    %cst_17 = arith.constant dense<0.000000e+00> : vector<2x128xf32>
    %78 = tpu.matmul %76, %77, %cst_17 {dimension_numbers = #tpu.dot_dimension_numbers<[1], [0], [0], [1], [0, 0, 1, 1], [], []>} : vector<2x128xf32>, vector<128x128xf32>, vector<2x128xf32> -> vector<2x128xf32>
    %c0_18 = arith.constant 0 : index
    %c0_19 = arith.constant 0 : index
    %c0_20 = arith.constant 0 : index
    %79 = vector.load %arg6[%c0_18, %c0_19, %c0_20] : memref<1x2x128xf32, #tpu.memory_space<vmem>>, vector<1x2x128xf32>
    %80 = vector.shape_cast %79 : vector<1x2x128xf32> to vector<2x128xf32>
    %81 = vector.shape_cast %78 : vector<2x128xf32> to vector<1x2x128xf32>
    tpu.vector_store %arg6[%c0_18, %c0_19, %c0_20], %81 {strides = array<i32>} : memref<1x2x128xf32, #tpu.memory_space<vmem>>, vector<1x2x128xf32>,
    return
  }
  func.func @transform_0(%arg0: i32) -> (i32, i32, i32) {
    %c0_i32 = arith.constant 0 : i32
    %c0_i32_0 = arith.constant 0 : i32
    %c0_i32_1 = arith.constant 0 : i32
    return %arg0, %c0_i32, %c0_i32_0 : i32, i32, i32
  }
  func.func @transform_1(%arg0: i32) -> (i32, i32) {
    %c0_i32 = arith.constant 0 : i32
    %c0_i32_0 = arith.constant 0 : i32
    %c0_i32_1 = arith.constant 0 : i32
    return %c0_i32, %c0_i32_0 : i32, i32
  }
  func.func @transform_2(%arg0: i32) -> (i32, i32) {
    %c0_i32 = arith.constant 0 : i32
    %c0_i32_0 = arith.constant 0 : i32
    %c0_i32_1 = arith.constant 0 : i32
    return %c0_i32, %c0_i32_0 : i32, i32
  }
  func.func @transform_3(%arg0: i32) -> (i32, i32) {
    %c0_i32 = arith.constant 0 : i32
    %c0_i32_0 = arith.constant 0 : i32
    %c0_i32_1 = arith.constant 0 : i32
    return %c0_i32, %c0_i32_0 : i32, i32
  }
  func.func @transform_4(%arg0: i32) -> (i32, i32) {
    %c0_i32 = arith.constant 0 : i32
    %c0_i32_0 = arith.constant 0 : i32
    %c0_i32_1 = arith.constant 0 : i32
    return %c0_i32, %c0_i32_0 : i32, i32
  }
  func.func @transform_5(%arg0: i32) -> (i32, i32, i32) {
    %c0_i32 = arith.constant 0 : i32
    %c0_i32_0 = arith.constant 0 : i32
    %c0_i32_1 = arith.constant 0 : i32
    return %arg0, %c0_i32, %c0_i32_0 : i32, i32, i32
  }
}

</mosaic_0001>

<bundles_post_ra>
// kernel: band_feature_model_forward.1
= control target key start
LH: loop header
LB: loop body
LE: loop exit
PB: predicated region body
PF: predicated region fallthrough
CT: control target
= control target key end

     0   :  { %10 = vsyncpa [#allocation3], 0  ;;  %s2832_s0 = inlined_call_operand.vmem [shape: f32[4,16,128], index: 0, kind: input, shape index: {}]   ;;  %s2833_s1 = inlined_call_operand.vmem [shape: bf16[128,1024], index: 1, kind: input, shape index: {}]   ;;  %s2834_s2 = inlined_call_operand.vmem [shape: bf16[128,1024], index: 2, kind: input, shape index: {}]   ;;  %s2835_s3 = inlined_call_operand.vmem [shape: f32[8,256], index: 3, kind: input, shape index: {}]   ;;  %s2836_s4 = inlined_call_operand.vmem [shape: f32[128,128], index: 4, kind: input, shape index: {}]   ;;  %s2837_s5 = inlined_call_operand.hbm [shape: f32[2,2,128], index: 5, kind: output, shape index: {}]  }
   0x1   :  { %12 = vsyncpa [#allocation3 + $0x1], 0  ;;  %s2189_s18 = smov 0   ;;  %s2191_s19 = smov 0  }
   0x2   :  { %s2193_s20 = smov 0   ;;  %s2195_s21 = smov 0  }
   0x3 LB: > { %s2210_s22 = sadd.s32 4294967295, %s2152_s21   ;;  %s1818_s23 = sadd.s32 4294967294, %s2152_s21   ;;  %s2152_s21 = sphi %s2195_s21, %s2844_s21   ;;  %s2148_s20 = sphi %s2193_s20, %s2843_s20   ;;  %s2144_s19 = sphi %s2191_s19, %s2842_s19   ;;  %s2140_s18 = sphi %s2189_s18, %s2841_s18  }
   0x4   : > { %s2214_s24 = sadd.s32 1, %s2152_s21   ;;  %s135_s25 = sadd.s32 1, %s2148_s20 }
   0x5   : > { %s132_s26 = ssub.s32 %s2152_s21, %s2214_s24  ;;  %p145_p0 = scmp.ne.s32.totalorder %s2148_s20, %s2144_s19 }
   0x6   : > { %p133_p1 = scmp.eq.s32.totalorder %s132_s26, 0  ;;  %p146_p2 = scmp.eq.s32.totalorder %s2210_s22, 1 }
   0x7   : > { %p151_p3 = scmp.ne.s32.totalorder %s2144_s19, %s2140_s18  ;;  %p152_p4 = scmp.eq.s32.totalorder %s1818_s23, 1 }
   0x8   : > { %s2225_s27 = scalar_select %p133_p1, %s2148_s20, %s135_s25  }
   0x9   : > { %p2227_p5 = por %p146_p2, %p145_p0  ;;  %p2231_p6 = por %p152_p4, %p151_p3 }
   0xa   : > { %p1821_p7 = scmp.ge.s32.totalorder %s2152_s21, 1  ;;  %p192_p8 = scmp.lt.s32.totalorder %s2152_s21, 3 }
   0xc   : > { %p193_p9 = pnand %p1821_p7, %p192_p8 }
   0xd   : > { %v237_v0 = vld [vmem:[%s2833_s1] sm:$0xff] (!%p193_p9)  ;;  %v238_v2 = vld [vmem:[%s2833_s1 + $0x8] sm:$0xff] (!%p193_p9)  ;;  %s1823_s11 = sshll.u32 (!%p193_p9), %s2210_s22, 1  ;;  %v2154_v8 = vmov (!%p193_p9), 0   ;;  %vm1097_vm0 = vcmask (!%p193_p9), 1041409   ;;  %vm2156_vm1 = vmmov (!%p193_p9), 0  }
   0xe   : > { %196 = sbr.rel (%p193_p9) target bundleno = 614 (0x266), region = 40  ;;  %v241_v1 = vld [vmem:[%s2833_s1 + $0x20] sm:$0xff] (!%p193_p9)  ;;  %v242_v4 = vld [vmem:[%s2833_s1 + $0x28] sm:$0xff] (!%p193_p9)  ;;  %653 = vmatprep.mubr.bf16.mxu0 (!%p193_p9), %v2154_v8  ;;  %706 = vmatprep.mubr.bf16.mxu1 (!%p193_p9), %v2154_v8  ;;  %p2258_p10 = scmp.lt.s32.totalorder (!%p193_p9), %s1823_s11, 3  ;;  %vm841_vm2 = vcmask (!%p193_p9), 1040384   ;;  %vm882_vm3 = vcmask (!%p193_p9), 1046528  }
   0xf   : > { %v1827_v3 = vcombine.high (!%p193_p9), %v237_v0, %v241_v1  ;;  %v1826_v5 = vcombine.low (!%p193_p9), %v237_v0, %v241_v1  ;;  %v245_v6 = vld [vmem:[%s2833_s1 + $0x40] sm:$0xff] (!%p193_p9)  ;;  %v1829_v9 = vcombine.high (!%p193_p9), %v238_v2, %v242_v4  ;;  %v1828_v10 = vcombine.low (!%p193_p9), %v238_v2, %v242_v4  ;;  %v246_v12 = vld [vmem:[%s2833_s1 + $0x48] sm:$0xff] (!%p193_p9) }
  0x10   : > { %v249_v7 = vld [vmem:[%s2833_s1 + $0x60] sm:$0xff] (!%p193_p9)  ;;  %v250_v13 = vld [vmem:[%s2833_s1 + $0x68] sm:$0xff] (!%p193_p9)  ;;  %vm923_vm4 = vcmask (!%p193_p9), 1045504  }
  0x11   : > { %v1835_v11 = vcombine.high (!%p193_p9), %v245_v6, %v249_v7  ;;  %v253_v14 = vld [vmem:[%s2833_s1 + $0x80] sm:$0xff] (!%p193_p9)  ;;  %621 = vmatprep.subr.bf16.mxu0 (!%p193_p9), %v1827_v3  ;;  %v1837_v15 = vcombine.high (!%p193_p9), %v246_v12, %v250_v13  ;;  %v254_v17 = vld [vmem:[%s2833_s1 + $0x88] sm:$0xff] (!%p193_p9)  ;;  %674 = vmatprep.subr.bf16.mxu1 (!%p193_p9), %v1829_v9  ;;  %v1834_v19 = vcombine.low (!%p193_p9), %v245_v6, %v249_v7 }
  0x12   : > { %v257_v16 = vld [vmem:[%s2833_s1 + $0xa0] sm:$0xff] (!%p193_p9)  ;;  %v258_v18 = vld [vmem:[%s2833_s1 + $0xa8] sm:$0xff] (!%p193_p9)  ;;  %622 = vmatpush1.bf16.msra.mxu0 (!%p193_p9), %v1826_v5  ;;  %675 = vmatpush1.bf16.msra.mxu1 (!%p193_p9), %v1828_v10  ;;  %v1836_v20 = vcombine.low (!%p193_p9), %v246_v12, %v250_v13  ;;  %v239_v10 = vld [vmem:[%s2833_s1 + $0x10] sm:$0xff] (!%p193_p9) }
  0x13   : > { %623 = vmatprep.subr.bf16.mxu0 (!%p193_p9), %v1835_v11  ;;  %v1843_v21 = vcombine.high (!%p193_p9), %v253_v14, %v257_v16  ;;  %676 = vmatprep.subr.bf16.mxu1 (!%p193_p9), %v1837_v15  ;;  %v1845_v22 = vcombine.high (!%p193_p9), %v254_v17, %v258_v18  ;;  %v261_v23 = vld [vmem:[%s2833_s1 + $0xc0] sm:$0xff] (!%p193_p9)  ;;  %v262_v25 = vld [vmem:[%s2833_s1 + $0xc8] sm:$0xff] (!%p193_p9)  ;;  %v1842_v27 = vcombine.low (!%p193_p9), %v253_v14, %v257_v16  ;;  %v243_v11 = vld [vmem:[%s2833_s1 + $0x30] sm:$0xff] (!%p193_p9) }
  0x14   : > { %v265_v24 = vld [vmem:[%s2833_s1 + $0xe0] sm:$0xff] (!%p193_p9)  ;;  %v266_v26 = vld [vmem:[%s2833_s1 + $0xe8] sm:$0xff] (!%p193_p9)  ;;  %v1844_v28 = vcombine.low (!%p193_p9), %v254_v17, %v258_v18  ;;  %v240_v12 = vld [vmem:[%s2833_s1 + $0x18] sm:$0xff] (!%p193_p9)  ;;  %v1831_v18 = vcombine.high (!%p193_p9), %v239_v10, %v243_v11 }
  0x15   : > { %s2846_s11 = smov (!%p2258_p10, %s1823_s11), 3  ;;  %v1851_v29 = vcombine.high %v261_v23, %v265_v24  ;;  %v1853_v30 = vcombine.high %v262_v25, %v266_v26  ;;  %v269_v31 = vld [vmem:[%s2833_s1 + $0x100] sm:$0xff]  ;;  %v270_v33 = vld [vmem:[%s2833_s1 + $0x108] sm:$0xff]  ;;  %v1850_v35 = vcombine.low %v261_v23, %v265_v24  ;;  %v1852_v36 = vcombine.low %v262_v25, %v266_v26  ;;  %v244_v13 = vld [vmem:[%s2833_s1 + $0x38] sm:$0xff] }
  0x16   : > { %624 = vmatpush1.bf16.msra.mxu0 %v1834_v19  ;;  %s1958_s8 = sshll.u32 %s2846_s11, 4  ;;  %677 = vmatpush1.bf16.msra.mxu1 %v1836_v20  ;;  %v273_v32 = vld [vmem:[%s2833_s1 + $0x120] sm:$0xff]  ;;  %v274_v34 = vld [vmem:[%s2833_s1 + $0x128] sm:$0xff]  ;;  %v1833_v20 = vcombine.high %v240_v12, %v244_v13  ;;  %v248_v23 = vld [vmem:[%s2833_s1 + $0x58] sm:$0xff]  ;;  %v1830_v26 = vcombine.low %v239_v10, %v243_v11  ;;  %s218_s11 = sand.u32 1, %s2144_s19  }
  0x17   : > { %625 = vmatprep.subr.bf16.mxu0 %v1843_v21  ;;  %678 = vmatprep.subr.bf16.mxu1 %v1845_v22  ;;  %s226_s26 = scalar_lea.vmem %s2832_s0, %s1958_s8  ;;  %v1859_v37 = vcombine.high %v269_v31, %v273_v32  ;;  %v277_v38 = vld [vmem:[%s2833_s1 + $0x140] sm:$0xff]  ;;  %v1861_v39 = vcombine.high %v270_v33, %v274_v34  ;;  %v278_v43 = vld [vmem:[%s2833_s1 + $0x148] sm:$0xff]  ;;  %v1858_v45 = vcombine.low %v269_v31, %v273_v32  ;;  %v247_v21 = vld [vmem:[%s2833_s1 + $0x50] sm:$0xff]  ;;  %s1822_s17 = sshll.u32 %s218_s11, 1 }
  0x18   : > { %v281_v40 = vld [vmem:[%s2833_s1 + $0x160] sm:$0xff]  ;;  %v230_v42 = vld [vmem:[%s226_s26 + $0x8] sm:$0xff]  ;;  %v1860_v46 = vcombine.low %v270_v33, %v274_v34  ;;  %v231_v52 = vld [vmem:[%s226_s26 + $0x10] sm:$0xff]  ;;  %s220_s25 = scalar_lea.vmem [#allocation2], %s1822_s17  ;;  %s1746_s9 = scalar_lea.sflag [#allocation3], %s218_s11 }
  0x19   : > { %v229_v41 = vld [vmem:[%s226_s26] sm:$0xff]  ;;  %v282_v44 = vld [vmem:[%s2833_s1 + $0x168] sm:$0xff]  ;;  %v1867_v47 = vcombine.high %v277_v38, %v281_v40  ;;  %v232_v53 = vld [vmem:[%s226_s26 + $0x18] sm:$0xff]  ;;  %v1866_v58 = vcombine.low %v277_v38, %v281_v40  ;;  %s1759_s30 = sshll.u32 %s220_s25, 4  ;;  %s1955_s26 = sshll.u32 %s2210_s22, 5  ;;  %s2787_s30 = int_to_ptr.vmem [resolvable:$true] %s1759_s30 }
  0x1a   : > { %626 = vmatpush1.bf16.msra.mxu0 %v1842_v27  ;;  %679 = vmatpush1.bf16.msra.mxu1 %v1844_v28  ;;  %v285_v48 = vld [vmem:[%s2833_s1 + $0x180] sm:$0xff]  ;;  %v2324_v49 = vpack.c.bf16 %v230_v42, %v229_v41  ;;  %v1869_v50 = vcombine.high %v278_v43, %v282_v44  ;;  %v286_v54 = vld [vmem:[%s2833_s1 + $0x188] sm:$0xff]  ;;  %v2335_v56 = vpack.c.bf16 %v232_v53, %v231_v52  ;;  %v251_v22 = vld [vmem:[%s2833_s1 + $0x70] sm:$0xff]  ;;  %s2792_s7 = scalar_lea.hbm %s2837_s5, %s1955_s26  ;;  %s2090_s8 = scalar_lea.vmem %s2787_s30, 32 }
  0x1b   : > { %627 = vmatprep.subr.bf16.mxu0 %v1851_v29  ;;  %680 = vmatprep.subr.bf16.mxu1 %v1853_v30  ;;  %v289_v51 = vld [vmem:[%s2833_s1 + $0x1a0] sm:$0xff]  ;;  %v290_v55 = vld [vmem:[%s2833_s1 + $0x1a8] sm:$0xff]  ;;  %v1868_v59 = vcombine.low %v278_v43, %v282_v44  ;;  %v252_v24 = vld [vmem:[%s2833_s1 + $0x78] sm:$0xff]  ;;  %v1832_v27 = vcombine.low %v240_v12, %v244_v13  ;;  %v1839_v28 = vcombine.high %v247_v21, %v251_v22  ;;  %p2091_p11 = scmp.ne.s32.totalorder %s2787_s30, %s2090_s8  ;;  %s2158_s22 = smov [#allocation2]  }
  0x1c   : > { %v1357_v57 = vunpack.c.h.b16 %v2324_v49  ;;  %v1875_v60 = vcombine.high %v285_v48, %v289_v51  ;;  %v1358_v61 = vunpack.c.h.b16 %v2335_v56  ;;  %v1877_v62 = vcombine.high %v286_v54, %v290_v55  ;;  %v293_v63 = vld [vmem:[%s2833_s1 + $0x1c0] sm:$0xff]  ;;  %v294_v1 = vld [vmem:[%s2833_s1 + $0x1c8] sm:$0xff]  ;;  %v255_v30 = vld [vmem:[%s2833_s1 + $0x90] sm:$0xff]  ;;  %s2094_s10 = sshll.u32 %s2158_s22, 4  ;;  %s2095_s10 = int_to_ptr.vmem [resolvable:$false] %s2094_s10 }
  0x1d   : > { %v297_v0 = vld [vmem:[%s2833_s1 + $0x1e0] sm:$0xff]  ;;  %v298_v2 = vld [vmem:[%s2833_s1 + $0x1e8] sm:$0xff]  ;;  %v1874_v4 = vcombine.low %v285_v48, %v289_v51  ;;  %v1876_v5 = vcombine.low %v286_v54, %v290_v55  ;;  %v1841_v29 = vcombine.high %v248_v23, %v252_v24  ;;  %v259_v31 = vld [vmem:[%s2833_s1 + $0xb0] sm:$0xff]  ;;  %v1838_v34 = vcombine.low %v247_v21, %v251_v22  ;;  %p2092_p12 = pnand %p2091_p11, %p2227_p5  ;;  %s2096_s12 = scalar_lea.vmem %s2095_s10, 64 }
  0x1e   : > { %628 = vmatpush1.bf16.msra.mxu0 %v1850_v35  ;;  %681 = vmatpush1.bf16.msra.mxu1 %v1852_v36  ;;  %v1359_v3 = vrot.slane %v1357_v57, 7  ;;  %v1883_v6 = vcombine.high %v293_v63, %v297_v0  ;;  %v1360_v7 = vrot.slane %v1358_v61, 6  ;;  %v1885_v9 = vcombine.high %v294_v1, %v298_v2  ;;  %v256_v32 = vld [vmem:[%s2833_s1 + $0x98] sm:$0xff]  ;;  %v263_v38 = vld [vmem:[%s2833_s1 + $0xd0] sm:$0xff]  ;;  %v1032_v21 = vld [vmem:[%s2834_s2 + $0x20] sm:$0xff]  ;;  %p2097_p0 = scmp.lt.s32.totalorder %s2787_s30, %s2095_s10  ;;  %p2098_p1 = scmp.lt.s32.totalorder %s2096_s12, %s2090_s8 }
  0x1f   : > { %629 = vmatprep.subr.bf16.mxu0 %v1859_v37  ;;  %682 = vmatprep.subr.bf16.mxu1 %v1861_v39  ;;  %v1485_v15 = vrot.slane %v1357_v57, 6  ;;  %v1882_v16 = vcombine.low %v293_v63, %v297_v0  ;;  %v1884_v17 = vcombine.low %v294_v1, %v298_v2  ;;  %v1486_v19 = vrot.slane %v1358_v61, 5  ;;  %v260_v33 = vld [vmem:[%s2833_s1 + $0xb8] sm:$0xff]  ;;  %v267_v39 = vld [vmem:[%s2833_s1 + $0xf0] sm:$0xff]  ;;  %p2093_p13 = pneg %p2092_p12 }
  0x20   : > { %v2364_v14 = vsel %vm1097_vm0, %v1360_v7, %v1359_v3  ;;  %v1840_v35 = vcombine.low %v248_v23, %v252_v24  ;;  %v1847_v36 = vcombine.high %v255_v30, %v259_v31  ;;  %v1849_v37 = vcombine.high %v256_v32, %v260_v33  ;;  %v264_v40 = vld [vmem:[%s2833_s1 + $0xd8] sm:$0xff]  ;;  %v279_v55 = vld [vmem:[%s2833_s1 + $0x150] sm:$0xff]  ;;  %p2099_p2 = por %p2098_p1, %p2097_p0 }
  0x21   : > { %v2379_v25 = vsel %vm1097_vm0, %v1486_v19, %v1485_v15  ;;  %v268_v41 = vld [vmem:[%s2833_s1 + $0xf8] sm:$0xff]  ;;  %v1846_v42 = vcombine.low %v255_v30, %v259_v31  ;;  %v1848_v43 = vcombine.low %v256_v32, %v260_v33  ;;  %v1855_v44 = vcombine.high %v263_v38, %v267_v39  ;;  %v283_v57 = vld [vmem:[%s2833_s1 + $0x170] sm:$0xff]  ;;  %v1033_v19 = vld [vmem:[%s2834_s2 + $0x28] sm:$0xff] }
  0x22   : > { %630 = vmatpush1.bf16.msra.mxu0 %v1858_v45  ;;  %683 = vmatpush1.bf16.msra.mxu1 %v1860_v46  ;;  %v1857_v45 = vcombine.high %v264_v40, %v268_v41  ;;  %v271_v46 = vld [vmem:[%s2833_s1 + $0x110] sm:$0xff]  ;;  %v272_v48 = vld [vmem:[%s2833_s1 + $0x118] sm:$0xff]  ;;  %v1854_v51 = vcombine.low %v263_v38, %v267_v39  ;;  %v1856_v52 = vcombine.low %v264_v40, %v268_v41  ;;  %v1040_v30 = vld [vmem:[%s2834_s2 + $0x60] sm:$0xff]  ;;  %p2100_p3 = pnand %p2099_p2, %p2093_p13 }
  0x23   : > { %631 = vmatprep.subr.bf16.mxu0 %v1867_v47  ;;  %684 = vmatprep.subr.bf16.mxu1 %v1869_v50  ;;  %v275_v47 = vld [vmem:[%s2833_s1 + $0x130] sm:$0xff]  ;;  %v276_v50 = vld [vmem:[%s2833_s1 + $0x138] sm:$0xff]  ;;  %v1048_v38 = vld [vmem:[%s2834_s2 + $0xa0] sm:$0xff] }
  0x24   : > { %v1863_v53 = vcombine.high %v271_v46, %v275_v47  ;;  %v1865_v54 = vcombine.high %v272_v48, %v276_v50  ;;  %v1864_v61 = vcombine.low %v272_v48, %v276_v50  ;;  %v287_v0 = vld [vmem:[%s2833_s1 + $0x190] sm:$0xff]  ;;  %v288_v2 = vld [vmem:[%s2833_s1 + $0x198] sm:$0xff] }
  0x25   : > { %v291_v1 = vld [vmem:[%s2833_s1 + $0x1b0] sm:$0xff]  ;;  %v292_v3 = vld [vmem:[%s2833_s1 + $0x1b8] sm:$0xff] }
  0x26   : > { %632 = vmatpush1.bf16.msra.mxu0 %v1866_v58  ;;  %685 = vmatpush1.bf16.msra.mxu1 %v1868_v59  ;;  %v280_v58 = vld [vmem:[%s2833_s1 + $0x158] sm:$0xff]  ;;  %v1881_v7 = vcombine.high %v288_v2, %v292_v3  ;;  %v299_v10 = vld [vmem:[%s2833_s1 + $0x1f0] sm:$0xff]  ;;  %v1878_v13 = vcombine.low %v287_v0, %v291_v1  ;;  %v1880_v15 = vcombine.low %v288_v2, %v292_v3 }
  0x27   : > { %633 = vmatprep.subr.bf16.mxu0 %v1875_v60  ;;  %686 = vmatprep.subr.bf16.mxu1 %v1877_v62  ;;  %v284_v59 = vld [vmem:[%s2833_s1 + $0x178] sm:$0xff]  ;;  %v1862_v60 = vcombine.low %v271_v46, %v275_v47  ;;  %v1871_v62 = vcombine.high %v279_v55, %v283_v57  ;;  %v1056_v46 = vld [vmem:[%s2834_s2 + $0xe0] sm:$0xff] }
  0x28   : > { %v1873_v63 = vcombine.high %v280_v58, %v284_v59  ;;  %v296_v11 = vld [vmem:[%s2833_s1 + $0x1d8] sm:$0xff] }
  0x29   : > { %v300_v12 = vld [vmem:[%s2833_s1 + $0x1f8] sm:$0xff] }
  0x2a   : > { %634 = vmatpush1.bf16.msra.mxu0 %v1874_v4  ;;  %687 = vmatpush1.bf16.msra.mxu1 %v1876_v5  ;;  %v1870_v4 = vcombine.low %v279_v55, %v283_v57  ;;  %v1872_v5 = vcombine.low %v280_v58, %v284_v59  ;;  %v1888_v23 = vcombine.low %v296_v11, %v300_v12  ;;  %v1064_v55 = vld [vmem:[%s2834_s2 + $0x120] sm:$0xff] }
  0x2b   : > { %635 = vmatprep.subr.bf16.mxu0 %v1883_v6  ;;  %688 = vmatprep.subr.bf16.mxu1 %v1885_v9  ;;  %v1879_v6 = vcombine.high %v287_v0, %v291_v1  ;;  %v295_v9 = vld [vmem:[%s2833_s1 + $0x1d0] sm:$0xff]  ;;  %v1072_v0 = vld [vmem:[%s2834_s2 + $0x160] sm:$0xff] }
  0x2c   : > { %v1886_v22 = vcombine.low %v295_v9, %v299_v10 }
  0x2e   : > { %636 = vmatpush1.bf16.msra.mxu0 %v1882_v16  ;;  %689 = vmatpush1.bf16.msra.mxu1 %v1884_v17  ;;  %v1887_v16 = vcombine.high %v295_v9, %v299_v10  ;;  %v1889_v17 = vcombine.high %v296_v11, %v300_v12  ;;  %v1080_v9 = vld [vmem:[%s2834_s2 + $0x1a0] sm:$0xff]  ;;  %v1094_v11 = vunpack.c.l.b16 %v2324_v49 }
  0x2f   : > { %727 = vmatprep.subr.bf16.mxu0 %v1831_v18  ;;  %780 = vmatprep.subr.bf16.mxu1 %v1833_v20  ;;  %v1029_v18 = vld [vmem:[%s2834_s2 + $0x8] sm:$0xff]  ;;  %v1028_v20 = vld [vmem:[%s2834_s2] sm:$0xff] }
  0x30   : > { %v1891_v24 = vcombine.high %v1029_v18, %v1033_v19  ;;  %v1890_v31 = vcombine.low %v1029_v18, %v1033_v19  ;;  %v1906_v32 = vcombine.low %v1028_v20, %v1032_v21  ;;  %v1089_v18 = vld [vmem:[%s2834_s2 + $0x1e8] sm:$0xff]  ;;  %v1088_v19 = vld [vmem:[%s2834_s2 + $0x1e0] sm:$0xff] }
  0x31   : > { %654 = vmatmul.mubr.bf16.vlgmr.msra.gmra.mrb[0].mxu0 %v2324_v49  ;;  %707 = vmatmul.mubr.bf16.vlgmr.msra.gmra.mrb[0].mxu1 %v2324_v49 }
  0x32   : > { %728 = vmatpush1.bf16.msra.mxu0 %v1830_v26  ;;  %781 = vmatpush1.bf16.msra.mxu1 %v1832_v27  ;;  %v1907_v26 = vcombine.high %v1028_v20, %v1032_v21  ;;  %v1037_v27 = vld [vmem:[%s2834_s2 + $0x48] sm:$0xff]  ;;  %v1096_v20 = vrot.slane %v1094_v11, 1 }
  0x33   : > { %729 = vmatprep.subr.bf16.mxu0 %v1839_v28  ;;  %782 = vmatprep.subr.bf16.mxu1 %v1841_v29  ;;  %v1041_v28 = vld [vmem:[%s2834_s2 + $0x68] sm:$0xff]  ;;  %v1036_v29 = vld [vmem:[%s2834_s2 + $0x40] sm:$0xff] }
  0x34   : > { %663 = vmatprep.mubr.bf16.mxu0 %v2154_v8  ;;  %716 = vmatprep.mubr.bf16.mxu1 %v2154_v8  ;;  %v1893_v33 = vcombine.high %v1037_v27, %v1041_v28  ;;  %v1892_v39 = vcombine.low %v1037_v27, %v1041_v28  ;;  %v1908_v40 = vcombine.low %v1036_v29, %v1040_v30  ;;  %v1035_v27 = vld [vmem:[%s2834_s2 + $0x38] sm:$0xff]  ;;  %v1030_v28 = vld [vmem:[%s2834_s2 + $0x10] sm:$0xff] }
  0x36   : > { %730 = vmatpush1.bf16.msra.mxu0 %v1838_v34  ;;  %783 = vmatpush1.bf16.msra.mxu1 %v1840_v35  ;;  %v1909_v34 = vcombine.high %v1036_v29, %v1040_v30  ;;  %v1045_v35 = vld [vmem:[%s2834_s2 + $0x88] sm:$0xff]  ;;  %v1034_v29 = vld [vmem:[%s2834_s2 + $0x30] sm:$0xff] }
  0x37   : > { %731 = vmatprep.subr.bf16.mxu0 %v1847_v36  ;;  %784 = vmatprep.subr.bf16.mxu1 %v1849_v37  ;;  %v1049_v36 = vld [vmem:[%s2834_s2 + $0xa8] sm:$0xff]  ;;  %v1044_v37 = vld [vmem:[%s2834_s2 + $0x80] sm:$0xff] }
  0x38   : > { %v1895_v41 = vcombine.high %v1045_v35, %v1049_v36  ;;  %v1894_v47 = vcombine.low %v1045_v35, %v1049_v36  ;;  %v1910_v48 = vcombine.low %v1044_v37, %v1048_v38  ;;  %v1939_v35 = vcombine.high %v1030_v28, %v1034_v29  ;;  %v1039_v36 = vld [vmem:[%s2834_s2 + $0x58] sm:$0xff] }
  0x39   : > { %664 = vmatmul.mubr.bf16.gmra.mrb[4].mxu0 %v2335_v56  ;;  %717 = vmatmul.mubr.bf16.gmra.mrb[4].mxu1 %v2335_v56 }
  0x3a   : > { %732 = vmatpush1.bf16.msra.mxu0 %v1846_v42  ;;  %785 = vmatpush1.bf16.msra.mxu1 %v1848_v43  ;;  %v1911_v42 = vcombine.high %v1044_v37, %v1048_v38  ;;  %v1053_v43 = vld [vmem:[%s2834_s2 + $0xc8] sm:$0xff]  ;;  %v1043_v37 = vld [vmem:[%s2834_s2 + $0x78] sm:$0xff] }
  0x3b   : > { %733 = vmatprep.subr.bf16.mxu0 %v1855_v44  ;;  %786 = vmatprep.subr.bf16.mxu1 %v1857_v45  ;;  %v1057_v44 = vld [vmem:[%s2834_s2 + $0xe8] sm:$0xff]  ;;  %v1052_v45 = vld [vmem:[%s2834_s2 + $0xc0] sm:$0xff] }
  0x3c   : > { %759 = vmatprep.mubr.bf16.mxu0 %v2154_v8  ;;  %812 = vmatprep.mubr.bf16.mxu1 %v2154_v8  ;;  %v1897_v50 = vcombine.high %v1053_v43, %v1057_v44  ;;  %v1896_v57 = vcombine.low %v1053_v43, %v1057_v44  ;;  %v1912_v58 = vcombine.low %v1052_v45, %v1056_v46 }
  0x3d   : > { %v1938_v43 = vcombine.low %v1030_v28, %v1034_v29  ;;  %v1925_v44 = vcombine.high %v1039_v36, %v1043_v37 }
  0x3e   : > { %734 = vmatpush1.bf16.msra.mxu0 %v1854_v51  ;;  %787 = vmatpush1.bf16.msra.mxu1 %v1856_v52  ;;  %v1913_v51 = vcombine.high %v1052_v45, %v1056_v46  ;;  %v1061_v52 = vld [vmem:[%s2834_s2 + $0x108] sm:$0xff]  ;;  %v1047_v46 = vld [vmem:[%s2834_s2 + $0x98] sm:$0xff] }
  0x3f   : > { %735 = vmatprep.subr.bf16.mxu0 %v1863_v53  ;;  %788 = vmatprep.subr.bf16.mxu1 %v1865_v54  ;;  %v1065_v53 = vld [vmem:[%s2834_s2 + $0x128] sm:$0xff]  ;;  %v1060_v54 = vld [vmem:[%s2834_s2 + $0x100] sm:$0xff] }
  0x40   : > { %v1899_v59 = vcombine.high %v1061_v52, %v1065_v53  ;;  %v1898_v1 = vcombine.low %v1061_v52, %v1065_v53  ;;  %v1914_v2 = vcombine.low %v1060_v54, %v1064_v55 }
  0x42   : > { %736 = vmatpush1.bf16.msra.mxu0 %v1862_v60  ;;  %789 = vmatpush1.bf16.msra.mxu1 %v1864_v61  ;;  %v1915_v60 = vcombine.high %v1060_v54, %v1064_v55  ;;  %v1069_v61 = vld [vmem:[%s2834_s2 + $0x148] sm:$0xff]  ;;  %v1055_v55 = vld [vmem:[%s2834_s2 + $0xd8] sm:$0xff] }
  0x43   : > { %737 = vmatprep.subr.bf16.mxu0 %v1871_v62  ;;  %790 = vmatprep.subr.bf16.mxu1 %v1873_v63  ;;  %v1073_v62 = vld [vmem:[%s2834_s2 + $0x168] sm:$0xff]  ;;  %v1068_v63 = vld [vmem:[%s2834_s2 + $0x140] sm:$0xff] }
  0x44   : > { %v1901_v3 = vcombine.high %v1069_v61, %v1073_v62  ;;  %v1900_v10 = vcombine.low %v1069_v61, %v1073_v62  ;;  %v1916_v12 = vcombine.low %v1068_v63, %v1072_v0 }
  0x46   : > { %738 = vmatpush1.bf16.msra.mxu0 %v1870_v4  ;;  %791 = vmatpush1.bf16.msra.mxu1 %v1872_v5  ;;  %v1917_v4 = vcombine.high %v1068_v63, %v1072_v0  ;;  %v1077_v5 = vld [vmem:[%s2834_s2 + $0x188] sm:$0xff]  ;;  %v1063_v0 = vld [vmem:[%s2834_s2 + $0x118] sm:$0xff] }
  0x47   : > { %739 = vmatprep.subr.bf16.mxu0 %v1879_v6  ;;  %792 = vmatprep.subr.bf16.mxu1 %v1881_v7  ;;  %v1081_v6 = vld [vmem:[%s2834_s2 + $0x1a8] sm:$0xff]  ;;  %v1076_v7 = vld [vmem:[%s2834_s2 + $0x180] sm:$0xff] }
  0x48   : > { %v1918_v21 = vcombine.low %v1076_v7, %v1080_v9 }
  0x4a   : > { %740 = vmatpush1.bf16.msra.mxu0 %v1878_v13  ;;  %793 = vmatpush1.bf16.msra.mxu1 %v1880_v15  ;;  %v1903_v13 = vcombine.high %v1077_v5, %v1081_v6  ;;  %v1095_v15 = vunpack.c.l.b16 %v2335_v56 }
  0x4b   : > { %741 = vmatprep.subr.bf16.mxu0 %v1887_v16  ;;  %794 = vmatprep.subr.bf16.mxu1 %v1889_v17  ;;  %v1919_v16 = vcombine.high %v1076_v7, %v1080_v9  ;;  %v1085_v17 = vld [vmem:[%s2834_s2 + $0x1c8] sm:$0xff]  ;;  %v1071_v7 = vld [vmem:[%s2834_s2 + $0x158] sm:$0xff] }
  0x4c   : > { %v1904_v30 = vcombine.low %v1085_v17, %v1089_v18  ;;  %v1075_v9 = vld [vmem:[%s2834_s2 + $0x178] sm:$0xff] }
  0x4e   : > { %742 = vmatpush1.bf16.msra.mxu0 %v1886_v22  ;;  %795 = vmatpush1.bf16.msra.mxu1 %v1888_v23  ;;  %v1905_v22 = vcombine.high %v1085_v17, %v1089_v18  ;;  %v1222_v23 = vrot.slane %v1095_v15, 7  ;;  %v1079_v17 = vld [vmem:[%s2834_s2 + $0x198] sm:$0xff] }
  0x4f   : > { %1181 = vmatprep.subr.bf16.mxu0 %v1891_v24  ;;  %1306 = vmatprep.subr.bf16.mxu1 %v1907_v26  ;;  %v1031_v26 = vld [vmem:[%s2834_s2 + $0x18] sm:$0xff] }
  0x50   : > { %v1083_v18 = vld [vmem:[%s2834_s2 + $0x1b8] sm:$0xff] }
  0x51   : > { %760 = vmatmul.mubr.bf16.vlgmr.msra.gmra.mrb[8].mxu0 %v2324_v49  ;;  %813 = vmatmul.mubr.bf16.vlgmr.msra.gmra.mrb[8].mxu1 %v2324_v49  ;;  %v1084_v49 = vld [vmem:[%s2834_s2 + $0x1c0] sm:$0xff]  ;;  %v1934_v28 = vcombine.low %v1079_v17, %v1083_v18 }
  0x52   : > { %1182 = vmatpush1.bf16.msra.mxu0 %v1890_v31  ;;  %1307 = vmatpush1.bf16.msra.mxu1 %v1906_v32  ;;  %v1921_v24 = vcombine.high %v1084_v49, %v1088_v19  ;;  %v1098_v31 = vsel %vm1097_vm0, %v1095_v15, %v1096_v20  ;;  %v1920_v32 = vcombine.low %v1084_v49, %v1088_v19  ;;  %v1078_v49 = vld [vmem:[%s2834_s2 + $0x190] sm:$0xff] }
  0x53   : > { %1183 = vmatprep.subr.bf16.mxu0 %v1893_v33  ;;  %1308 = vmatprep.subr.bf16.mxu1 %v1909_v34  ;;  %v1223_v33 = vsel %vm1097_vm0, %v1222_v23, %v1094_v11  ;;  %v1923_v34 = vcombine.high %v1031_v26, %v1035_v27  ;;  %v1099_v38 = vpack.c.b16 %v1098_v31, %v1098_v31  ;;  %v1074_v11 = vld [vmem:[%s2834_s2 + $0x170] sm:$0xff]  ;;  %v1087_v23 = vld [vmem:[%s2834_s2 + $0x1d8] sm:$0xff] }
  0x54   : > { %769 = vmatprep.mubr.bf16.mxu0 %v2154_v8  ;;  %822 = vmatprep.mubr.bf16.mxu1 %v2154_v8  ;;  %v1933_v15 = vcombine.high %v1071_v7, %v1075_v9  ;;  %v1082_v19 = vld [vmem:[%s2834_s2 + $0x1b0] sm:$0xff] }
  0x55   : > { %v1950_v29 = vcombine.low %v1078_v49, %v1082_v19 }
  0x56   : > { %1184 = vmatpush1.bf16.msra.mxu0 %v1892_v39  ;;  %1309 = vmatpush1.bf16.msra.mxu1 %v1908_v40  ;;  %v1038_v39 = vld [vmem:[%s2834_s2 + $0x50] sm:$0xff] }
  0x57   : > { %1185 = vmatprep.subr.bf16.mxu0 %v1895_v41  ;;  %1310 = vmatprep.subr.bf16.mxu1 %v1911_v42  ;;  %v1042_v40 = vld [vmem:[%s2834_s2 + $0x70] sm:$0xff]  ;;  %v1224_v41 = vpack.c.b16 %v1223_v33, %v1223_v33  ;;  %v1922_v42 = vcombine.low %v1031_v26, %v1035_v27 }
  0x58   : > { %v1941_v45 = vcombine.high %v1038_v39, %v1042_v40  ;;  %v1940_v52 = vcombine.low %v1038_v39, %v1042_v40  ;;  %v1086_v26 = vld [vmem:[%s2834_s2 + $0x1d0] sm:$0xff]  ;;  %v2155_v39 = vmov 0.0|0.0  }
  0x59   : > { %770 = vmatmul.mubr.bf16.gmra.mrb[12].mxu0 %v2335_v56  ;;  %823 = vmatmul.mubr.bf16.gmra.mrb[12].mxu1 %v2335_v56  ;;  %v1902_v56 = vcombine.low %v1077_v5, %v1081_v6  ;;  %v1090_v27 = vld [vmem:[%s2834_s2 + $0x1f0] sm:$0xff] }
  0x5a   : > { %1186 = vmatpush1.bf16.msra.mxu0 %v1894_v47  ;;  %1311 = vmatpush1.bf16.msra.mxu1 %v1910_v48  ;;  %v1051_v47 = vld [vmem:[%s2834_s2 + $0xb8] sm:$0xff]  ;;  %v1046_v48 = vld [vmem:[%s2834_s2 + $0x90] sm:$0xff]  ;;  %v1953_v31 = vcombine.high %v1086_v26, %v1090_v27  ;;  %v1952_v33 = vcombine.low %v1086_v26, %v1090_v27 }
  0x5b   : > { %1187 = vmatprep.subr.bf16.mxu0 %v1897_v50  ;;  %1312 = vmatprep.subr.bf16.mxu1 %v1913_v51  ;;  %v1050_v50 = vld [vmem:[%s2834_s2 + $0xb0] sm:$0xff]  ;;  %v1924_v51 = vcombine.low %v1039_v36, %v1043_v37  ;;  %v1927_v53 = vcombine.high %v1047_v46, %v1051_v47  ;;  %v1653_v36 = vld [vmem:[%s2836_s4] sm:$0xff]  ;;  %v1654_v37 = vld [vmem:[%s2836_s4 + $0x8] sm:$0xff] }
  0x5c   : > { %1213 = vmatprep.mubr.bf16.mxu0 %v2154_v8  ;;  %1338 = vmatprep.mubr.bf16.mxu1 %v2154_v8  ;;  %v1943_v54 = vcombine.high %v1046_v48, %v1050_v50  ;;  %v1942_v61 = vcombine.low %v1046_v48, %v1050_v50  ;;  %v1661_v48 = vld [vmem:[%s2836_s4 + $0x40] sm:$0xff]  ;;  %v1662_v50 = vld [vmem:[%s2836_s4 + $0x48] sm:$0xff] }
  0x5e   : > { %1188 = vmatpush1.bf16.msra.mxu0 %v1896_v57  ;;  %1313 = vmatpush1.bf16.msra.mxu1 %v1912_v58  ;;  %v1059_v57 = vld [vmem:[%s2834_s2 + $0xf8] sm:$0xff]  ;;  %v1054_v58 = vld [vmem:[%s2834_s2 + $0xd0] sm:$0xff] }
  0x5f   : > { %1189 = vmatprep.subr.bf16.mxu0 %v1899_v59  ;;  %1314 = vmatprep.subr.bf16.mxu1 %v1915_v60  ;;  %v1058_v59 = vld [vmem:[%s2834_s2 + $0xf0] sm:$0xff]  ;;  %v1926_v60 = vcombine.low %v1047_v46, %v1051_v47  ;;  %v1929_v62 = vcombine.high %v1055_v55, %v1059_v57  ;;  %v2157_v46 = vmov 0.0  }
  0x60   : > { %v1945_v63 = vcombine.high %v1054_v58, %v1058_v59 }
  0x62   : > { %1190 = vmatpush1.bf16.msra.mxu0 %v1898_v1  ;;  %1315 = vmatpush1.bf16.msra.mxu1 %v1914_v2  ;;  %v1067_v1 = vld [vmem:[%s2834_s2 + $0x138] sm:$0xff]  ;;  %v1066_v2 = vld [vmem:[%s2834_s2 + $0x130] sm:$0xff] }
  0x63   : > { %1191 = vmatprep.subr.bf16.mxu0 %v1901_v3  ;;  %1316 = vmatprep.subr.bf16.mxu1 %v1917_v4  ;;  %v1928_v3 = vcombine.low %v1055_v55, %v1059_v57  ;;  %v1944_v4 = vcombine.low %v1054_v58, %v1058_v59  ;;  %v1931_v5 = vcombine.high %v1063_v0, %v1067_v1  ;;  %v1665_v55 = vld [vmem:[%s2836_s4 + $0x60] sm:$0xff]  ;;  %v1666_v57 = vld [vmem:[%s2836_s4 + $0x68] sm:$0xff]  ;;  %v1667_v59 = vld [vmem:[%s2836_s4 + $0x70] sm:$0xff] }
  0x64   : > { %v2030_v58 = vpack.c.bf16 %v1666_v57, %v1665_v55 }
  0x66   : > { %1192 = vmatpush1.bf16.msra.mxu0 %v1900_v10  ;;  %1317 = vmatpush1.bf16.msra.mxu1 %v1916_v12  ;;  %v1070_v10 = vld [vmem:[%s2834_s2 + $0x150] sm:$0xff]  ;;  %v1930_v12 = vcombine.low %v1063_v0, %v1067_v1 }
  0x67   : > { %1193 = vmatprep.subr.bf16.mxu0 %v1903_v13  ;;  %1318 = vmatprep.subr.bf16.mxu1 %v1919_v16  ;;  %v1949_v16 = vcombine.high %v1070_v10, %v1074_v11  ;;  %v1948_v20 = vcombine.low %v1070_v10, %v1074_v11 }
  0x6a   : > { %1194 = vmatpush1.bf16.msra.mxu0 %v1902_v56  ;;  %1319 = vmatpush1.bf16.msra.mxu1 %v1918_v21  ;;  %v1932_v56 = vcombine.low %v1071_v7, %v1075_v9  ;;  %v1935_v21 = vcombine.high %v1079_v17, %v1083_v18 }
  0x6b   : > { %1195 = vmatprep.subr.bf16.mxu0 %v1905_v22  ;;  %1320 = vmatprep.subr.bf16.mxu1 %v1921_v24  ;;  %v1951_v22 = vcombine.high %v1078_v49, %v1082_v19  ;;  %v1091_v24 = vld [vmem:[%s2834_s2 + $0x1f8] sm:$0xff] }
  0x6e   : > { %1196 = vmatpush1.bf16.msra.mxu0 %v1904_v30  ;;  %1321 = vmatpush1.bf16.msra.mxu1 %v1920_v32  ;;  %v1937_v30 = vcombine.high %v1087_v23, %v1091_v24  ;;  %v1936_v32 = vcombine.low %v1087_v23, %v1091_v24 }
  0x6f   : > { %1444 = vmatprep.subr.bf16.mxu0 %v1923_v34  ;;  %1570 = vmatprep.subr.bf16.mxu1 %v1939_v35  ;;  %v1362_v34 = vpack.c.b16 %v2364_v14, %v2364_v14  ;;  %v1488_v35 = vpack.c.b16 %v2379_v25, %v2379_v25  ;;  %v1655_v14 = vld [vmem:[%s2836_s4 + $0x10] sm:$0xff]  ;;  %v1656_v25 = vld [vmem:[%s2836_s4 + $0x18] sm:$0xff] }
  0x70   : > { %v2015_v40 = vpack.c.bf16 %v1656_v25, %v1655_v14 }
  0x71   : > { %1214 = vmatmul.mubr.bf16.vlgmr.msra.gmra.mrb[16].mxu0 %v1099_v38  ;;  %1339 = vmatmul.mubr.bf16.vlgmr.msra.gmra.mrb[16].mxu1 %v1224_v41  ;;  %v2012_v38 = vpack.c.bf16 %v1654_v37, %v1653_v36  ;;  %v1657_v41 = vld [vmem:[%s2836_s4 + $0x20] sm:$0xff] }
  0x72   : > { %1445 = vmatpush1.bf16.msra.mxu0 %v1922_v42  ;;  %1571 = vmatpush1.bf16.msra.mxu1 %v1938_v43  ;;  %v1658_v42 = vld [vmem:[%s2836_s4 + $0x28] sm:$0xff] }
  0x73   : > { %1446 = vmatprep.subr.bf16.mxu0 %v1925_v44  ;;  %1572 = vmatprep.subr.bf16.mxu1 %v1941_v45  ;;  %v2018_v43 = vpack.c.bf16 %v1658_v42, %v1657_v41  ;;  %v1659_v44 = vld [vmem:[%s2836_s4 + $0x30] sm:$0xff]  ;;  %v1660_v45 = vld [vmem:[%s2836_s4 + $0x38] sm:$0xff] }
  0x74   : > { %1476 = vmatprep.mubr.bf16.mxu0 %v2154_v8  ;;  %1602 = vmatprep.mubr.bf16.mxu1 %v2154_v8  ;;  %v1062_v8 = vld [vmem:[%s2834_s2 + $0x110] sm:$0xff]  ;;  %v2021_v47 = vpack.c.bf16 %v1660_v45, %v1659_v44 }
  0x75   : > { %v1947_v6 = vcombine.high %v1062_v8, %v1066_v2  ;;  %v1946_v13 = vcombine.low %v1062_v8, %v1066_v2 }
  0x76   : > { %1447 = vmatpush1.bf16.msra.mxu0 %v1924_v51  ;;  %1573 = vmatpush1.bf16.msra.mxu1 %v1940_v52  ;;  %v2024_v51 = vpack.c.bf16 %v1662_v50, %v1661_v48  ;;  %v1663_v52 = vld [vmem:[%s2836_s4 + $0x50] sm:$0xff] }
  0x77   : > { %1448 = vmatprep.subr.bf16.mxu0 %v1927_v53  ;;  %1574 = vmatprep.subr.bf16.mxu1 %v1943_v54  ;;  %v1664_v53 = vld [vmem:[%s2836_s4 + $0x58] sm:$0xff] }
  0x78   : > { %v2027_v54 = vpack.c.bf16 %v1664_v53, %v1663_v52 }
  0x7a   : > { %1449 = vmatpush1.bf16.msra.mxu0 %v1926_v60  ;;  %1575 = vmatpush1.bf16.msra.mxu1 %v1942_v61  ;;  %v1668_v60 = vld [vmem:[%s2836_s4 + $0x78] sm:$0xff] }
  0x7b   : > { %1450 = vmatprep.subr.bf16.mxu0 %v1929_v62  ;;  %1576 = vmatprep.subr.bf16.mxu1 %v1945_v63  ;;  %v2033_v61 = vpack.c.bf16 %v1668_v60, %v1667_v59 }
  0x7e   : > { %1451 = vmatpush1.bf16.msra.mxu0 %v1928_v3  ;;  %1577 = vmatpush1.bf16.msra.mxu1 %v1944_v4 }
  0x7f   : > { %1452 = vmatprep.subr.bf16.mxu0 %v1931_v5  ;;  %1578 = vmatprep.subr.bf16.mxu1 %v1947_v6 }
  0x82   : > { %1453 = vmatpush1.bf16.msra.mxu0 %v1930_v12  ;;  %1579 = vmatpush1.bf16.msra.mxu1 %v1946_v13 }
  0x83   : > { %1454 = vmatprep.subr.bf16.mxu0 %v1933_v15  ;;  %1580 = vmatprep.subr.bf16.mxu1 %v1949_v16 }
  0x86   : > { %1455 = vmatpush1.bf16.msra.mxu0 %v1932_v56  ;;  %1581 = vmatpush1.bf16.msra.mxu1 %v1948_v20 }
  0x87   : > { %1456 = vmatprep.subr.bf16.mxu0 %v1935_v21  ;;  %1582 = vmatprep.subr.bf16.mxu1 %v1951_v22 }
  0x8a   : > { %1457 = vmatpush1.bf16.msra.mxu0 %v1934_v28  ;;  %1583 = vmatpush1.bf16.msra.mxu1 %v1950_v29 }
  0x8b   : > { %1458 = vmatprep.subr.bf16.mxu0 %v1937_v30  ;;  %1584 = vmatprep.subr.bf16.mxu1 %v1953_v31 }
  0x8e   : > { %1459 = vmatpush1.bf16.msra.mxu0 %v1936_v32  ;;  %1585 = vmatpush1.bf16.msra.mxu1 %v1952_v33 }
  0x8f   : > { %2011 = vmatprep.subr.bf16.mxu0 %v2155_v39 }
  0x91   : > { %1477 = vmatmul.mubr.bf16.vlgmr.msra.gmra.mrb[20].mxu0 %v1362_v34  ;;  %1603 = vmatmul.mubr.bf16.vlgmr.msra.gmra.mrb[20].mxu1 %v1488_v35 }
  0x92   : > { %2013 = vmatpush3.bf16.msra.mxu0 %v2012_v38  ;;  %2008 = vmatprep.mubr.msk.f32.mxu0 %vm2156_vm1, %v2157_v46  ;;  %v956_v38 = vlaneseq }
  0x93   : > { %2014 = vmatprep.subr.bf16.mxu0 %v2155_v39 }
  0x96   : > { %2016 = vmatpush3.bf16.msra.mxu0 %v2015_v40 }
  0x97   : > { %2017 = vmatprep.subr.bf16.mxu0 %v2155_v39 }
  0x9a   : > { %2019 = vmatpush3.bf16.msra.mxu0 %v2018_v43  ;;  %v2741_v43 = vld [vmem:[%s2835_s3] sm:$0xff] }
  0x9b   : > { %2020 = vmatprep.subr.bf16.mxu0 %v2155_v39 }
  0x9e   : > { %2022 = vmatpush3.bf16.msra.mxu0 %v2021_v47 }
  0x9f   : > { %2023 = vmatprep.subr.bf16.mxu0 %v2155_v39 }
  0xa2   : > { %2025 = vmatpush3.bf16.msra.mxu0 %v2024_v51  ;;  %v2746_v51 = vld [vmem:[%s2835_s3 + $0x8] sm:$0xff] }
  0xa3   : > { %2026 = vmatprep.subr.bf16.mxu0 %v2155_v39 }
  0xa6   : > { %2028 = vmatpush3.bf16.msra.mxu0 %v2027_v54 }
  0xa7   : > { %2029 = vmatprep.subr.bf16.mxu0 %v2155_v39 }
  0xaa   : > { %2031 = vmatpush3.bf16.msra.mxu0 %v2030_v58 }
  0xab   : > { %2032 = vmatprep.subr.bf16.mxu0 %v2155_v39  ;;  %v2735_v39 = vshrl.u32 %v956_v38, 7 }
  0xad   : > { %v958_v25 = vsub.s32 0, %v2735_v39 }
  0xae   : > { %2034 = vmatpush3.bf16.msra.mxu0 %v2033_v61 }
  0xaf   : > { %v2749_v54 = vrot.slane %v2741_v43, %v958_v25 }
 0x104   : > { %v655_v62 = vpop.f32.mrb[0].mxu0  ;;  %v708_v0 = vpop.f32.mrb[0].mxu1 }
 0x105   : > { %v842_v63 = vrot.slane %v655_v62, 7  ;;  %v657_v1 = vpop.f32.mrb[1].mxu0  ;;  %v710_v2 = vpop.f32.mrb[1].mxu1 }
 0x106   : > { %v843_v8 = vrot.slane %v657_v1, 7  ;;  %v659_v3 = vpop.f32.mrb[2].mxu0  ;;  %v712_v6 = vpop.f32.mrb[2].mxu1  ;;  %v963_v1 = vrot.slane %v2746_v51, %v958_v25 }
 0x107   : > { %v862_v4 = vsel %vm841_vm2, 0.0, %v842_v63  ;;  %v844_v5 = vrot.slane %v659_v3, 7  ;;  %v661_v7 = vpop.f32.mrb[3].mxu0  ;;  %v714_v12 = vpop.f32.mrb[3].mxu1 }
 0x108   : > { %v866_v9 = vadd.f32 %v862_v4, %v708_v0  ;;  %v863_v10 = vsel %vm841_vm2, 0.0, %v843_v8  ;;  %v846_v11 = vrot.slane %v661_v7, 7 }
 0x109   : > { %v867_v13 = vadd.f32 %v863_v10, %v710_v2  ;;  %v845_v15 = vsel %vm841_vm2, %v842_v63, %v844_v5 }
 0x10a   : > { %v868_v16 = vadd.f32 %v845_v15, %v712_v6  ;;  %v847_v17 = vsel %vm841_vm2, %v843_v8, %v846_v11 }
 0x10b   : > { %v869_v18 = vadd.f32 %v847_v17, %v714_v12 }
 0x10c   : > { %v665_v49 = vpop.f32.mrb[4].mxu0  ;;  %v718_v20 = vpop.f32.mrb[4].mxu1 }
 0x10d   : > { %v848_v19 = vrot.slane %v665_v49, 7  ;;  %v667_v56 = vpop.f32.mrb[5].mxu0  ;;  %v720_v23 = vpop.f32.mrb[5].mxu1 }
 0x10e   : > { %v849_v21 = vrot.slane %v667_v56, 7  ;;  %v669_v22 = vpop.f32.mrb[6].mxu0  ;;  %v722_v28 = vpop.f32.mrb[6].mxu1 }
 0x10f   : > { %v850_v24 = vrot.slane %v669_v22, 7  ;;  %v671_v26 = vpop.f32.mrb[7].mxu0  ;;  %v864_v27 = vsel %vm841_vm2, 0.0, %v848_v19  ;;  %v724_v32 = vpop.f32.mrb[7].mxu1 }
 0x110   : > { %v852_v29 = vrot.slane %v671_v26, 7  ;;  %v2724_v30 = vadd.f32 %v864_v27, %v718_v20  ;;  %v865_v31 = vsel %vm841_vm2, 0.0, %v849_v21 }
 0x111   : > { %v2727_v33 = vadd.f32 %v865_v31, %v720_v23  ;;  %v851_v34 = vsel %vm841_vm2, %v848_v19, %v850_v24 }
 0x112   : > { %v2730_v35 = vadd.f32 %v851_v34, %v722_v28  ;;  %v853_v36 = vsel %vm841_vm2, %v849_v21, %v852_v29 }
 0x113   : > { %v2733_v37 = vadd.f32 %v853_v36, %v724_v32 }
 0x124   : > { %v761_v14 = vpop.f32.mrb[8].mxu0  ;;  %v814_v41 = vpop.f32.mrb[8].mxu1 }
 0x125   : > { %v883_v40 = vrot.slane %v761_v14, 1  ;;  %v763_v42 = vpop.f32.mrb[9].mxu0  ;;  %v924_v44 = vrot.slane %v814_v41, 2  ;;  %v816_v45 = vpop.f32.mrb[9].mxu1 }
 0x126   : > { %v765_v46 = vpop.f32.mrb[10].mxu0  ;;  %v818_v48 = vpop.f32.mrb[10].mxu1  ;;  %v886_v52 = vrot.slane %v763_v42, 1  ;;  %v927_v58 = vrot.slane %v816_v45, 2 }
 0x127   : > { %v884_v47 = vrot.slane %v765_v46, 1  ;;  %v767_v50 = vpop.f32.mrb[11].mxu0  ;;  %v925_v53 = vrot.slane %v818_v48, 2  ;;  %v820_v57 = vpop.f32.mrb[11].mxu1 }
 0x128   : > { %v887_v55 = vrot.slane %v767_v50, 1  ;;  %v928_v61 = vrot.slane %v820_v57, 2 }
 0x129   : > { %v885_v59 = vsel %vm882_vm3, %v883_v40, %v884_v47  ;;  %v903_v60 = vsel %vm882_vm3, %v884_v47, 0.0  ;;  %v926_v0 = vsel %vm923_vm4, %v924_v44, %v925_v53  ;;  %v944_v8 = vsel %vm923_vm4, %v925_v53, 0.0 }
 0x12a   : > { %v907_v62 = vadd.f32 %v885_v59, %v866_v9  ;;  %v909_v63 = vadd.f32 %v903_v60, %v868_v16  ;;  %v888_v2 = vsel %vm882_vm3, %v886_v52, %v887_v55  ;;  %v904_v3 = vsel %vm882_vm3, %v887_v55, 0.0 }
 0x12b   : > { %v929_v4 = vsel %vm923_vm4, %v927_v58, %v928_v61  ;;  %v908_v7 = vadd.f32 %v888_v2, %v867_v13  ;;  %v910_v10 = vadd.f32 %v904_v3, %v869_v18  ;;  %v945_v9 = vsel %vm923_vm4, %v928_v61, 0.0 }
 0x12c   : > { %v948_v5 = vadd.f32 %v926_v0, %v907_v62  ;;  %v950_v6 = vadd.f32 %v944_v8, %v909_v63  ;;  %v771_v11 = vpop.f32.mrb[12].mxu0  ;;  %v824_v16 = vpop.f32.mrb[12].mxu1 }
 0x12d   : > { %v889_v12 = vrot.slane %v771_v11, 1  ;;  %v773_v15 = vpop.f32.mrb[13].mxu0  ;;  %v949_v19 = vadd.f32 %v929_v4, %v908_v7  ;;  %v951_v56 = vadd.f32 %v945_v9, %v910_v10  ;;  %v826_v21 = vpop.f32.mrb[13].mxu1  ;;  %v930_v24 = vrot.slane %v824_v16, 2 }
 0x12e   : > { %v964_v17 = vadd.f32 %v2749_v54, %v948_v5  ;;  %v966_v49 = vadd.f32 %v2749_v54, %v950_v6  ;;  %v775_v20 = vpop.f32.mrb[14].mxu0  ;;  %v892_v22 = vrot.slane %v773_v15, 1  ;;  %v933_v13 = vrot.slane %v826_v21, 2  ;;  %v828_v18 = vpop.f32.mrb[14].mxu1 }
 0x12f   : > { %v890_v23 = vrot.slane %v775_v20, 1  ;;  %v777_v26 = vpop.f32.mrb[15].mxu0  ;;  %v965_v29 = vadd.f32 %v963_v1, %v949_v19  ;;  %v967_v31 = vadd.f32 %v963_v1, %v951_v56  ;;  %v830_v32 = vpop.f32.mrb[15].mxu1  ;;  %v931_v14 = vrot.slane %v828_v18, 2 }
 0x130   : > { %v972_v27 = vmul.f32 %v964_v17, %v964_v17  ;;  %v973_v28 = vmul.f32 %v966_v49, %v966_v49  ;;  %v893_v38 = vrot.slane %v777_v26, 1  ;;  %v934_v58 = vrot.slane %v830_v32, 2 }
 0x131   : > { %v891_v34 = vsel %vm882_vm3, %v889_v12, %v890_v23  ;;  %v905_v36 = vsel %vm882_vm3, %v890_v23, 0.0  ;;  %v976_v25 = vmul.f32 %v965_v29, %v965_v29  ;;  %v977_v40 = vmul.f32 %v967_v31, %v967_v31 }
 0x132   : > { %v911_v41 = vadd.f32 %v891_v34, %v2724_v30  ;;  %v913_v42 = vadd.f32 %v905_v36, %v2730_v35  ;;  %v894_v44 = vsel %vm882_vm3, %v892_v22, %v893_v38  ;;  %v906_v45 = vsel %vm882_vm3, %v893_v38, 0.0 }
 0x133   : > { %v932_v46 = vsel %vm923_vm4, %v930_v24, %v931_v14  ;;  %v946_v47 = vsel %vm923_vm4, %v931_v14, 0.0  ;;  %v980_v48 = vadd.f32 %v976_v25, %v972_v27  ;;  %v981_v50 = vadd.f32 %v977_v40, %v973_v28 }
 0x134   : > { %v912_v52 = vadd.f32 %v894_v44, %v2727_v33  ;;  %v914_v53 = vadd.f32 %v906_v45, %v2733_v37  ;;  %v952_v55 = vadd.f32 %v932_v46, %v911_v41  ;;  %v954_v57 = vadd.f32 %v946_v47, %v913_v42 }
 0x135   : > { %2078 = vrsqrt.f32 %v980_v48  ;;  %v935_v59 = vsel %vm923_vm4, %v933_v13, %v934_v58  ;;  %v947_v60 = vsel %vm923_vm4, %v934_v58, 0.0  ;;  %v1349_v6 = vsub.s32 1, %v2735_v39 }
 0x136   : > { %2080 = vrsqrt.f32 %v981_v50  ;;  %v968_v30 = vadd.f32 %v2749_v54, %v952_v55  ;;  %v970_v35 = vadd.f32 %v2749_v54, %v954_v57  ;;  %v953_v61 = vadd.f32 %v935_v59, %v912_v52 }
 0x137   : > { %v955_v62 = vadd.f32 %v947_v60, %v914_v53  ;;  %vm986_vm5 = vcmp.eq.f32.partialorder %v980_v48, inf  ;;  %v989_v11 = vand.u32 2147483648, %v980_v48  ;;  %vm988_vm6 = vcmp.eq.f32.partialorder %v980_v48, 0.0 }
 0x138   : > { %v974_v63 = vmul.f32 %v968_v30, %v968_v30  ;;  %v969_v0 = vadd.f32 %v963_v1, %v953_v61  ;;  %v975_v33 = vmul.f32 %v970_v35, %v970_v35  ;;  %vm993_vm7 = vcmp.eq.f32.partialorder %v981_v50, inf }
 0x139   : > { %v971_v8 = vadd.f32 %v963_v1, %v955_v62  ;;  %v996_v12 = vand.u32 2147483648, %v981_v50  ;;  %v1350_v1 = vrot.slane %v2741_v43, %v1349_v6  ;;  %vm995_vm8 = vcmp.eq.f32.partialorder %v981_v50, 0.0 }
 0x13a   : > { %v978_v37 = vmul.f32 %v969_v0, %v969_v0  ;;  %v1354_v56 = vrot.slane %v2746_v51, %v1349_v6 }
 0x13b   : > { %v979_v2 = vmul.f32 %v971_v8, %v971_v8 }
 0x13c   : > { %v982_v3 = vadd.f32 %v978_v37, %v974_v63 }
 0x13d   : > { %v983_v4 = vadd.f32 %v979_v2, %v975_v33 }
 0x13e   : > { %2082 = vrsqrt.f32 %v982_v3  ;;  %vm1000_vm9 = vcmp.eq.f32.partialorder %v982_v3, inf  ;;  %vm1002_vm10 = vcmp.eq.f32.partialorder %v982_v3, 0.0  ;;  %v1003_v41 = vand.u32 2147483648, %v982_v3 }
 0x13f   : > { %v2079_v5 = vpop.eup %2078  ;;  %2084 = vrsqrt.f32 %v983_v4  ;;  %vm1007_vm11 = vcmp.eq.f32.partialorder %v983_v4, inf  ;;  %v1010_v46 = vand.u32 2147483648, %v983_v4  ;;  %vm1009_vm12 = vcmp.eq.f32.partialorder %v983_v4, 0.0 }
 0x140   : > { %v2081_v7 = vpop.eup %2080  ;;  %v985_v54 = vmul.f32 %v2079_v5, %v980_v48  ;;  %v1613_v5 = vsub.s32 2, %v2735_v39 }
 0x141   : > { %v992_v10 = vmul.f32 %v2081_v7, %v981_v50 }
 0x142   : > { %v987_v9 = vsel %vm986_vm5, %v980_v48, %v985_v54  ;;  %v1614_v54 = vrot.slane %v2741_v43, %v1613_v5 }
 0x143   : > { %v990_v16 = vsel %vm988_vm6, %v989_v11, %v987_v9  ;;  %v994_v17 = vsel %vm993_vm7, %v981_v50, %v992_v10  ;;  %v1618_v9 = vrot.slane %v2746_v51, %v1613_v5 }
 0x144   : > { %v1215_v15 = vpop.f32.mrb[16].mxu0  ;;  %v1340_v49 = vpop.f32.mrb[16].mxu1  ;;  %v997_v20 = vsel %vm995_vm8, %v996_v12, %v994_v17 }
 0x145   : > { %v1217_v19 = vpop.f32.mrb[17].mxu0  ;;  %v1341_v21 = vadd.f32 %v1340_v49, %v1215_v15  ;;  %v1342_v22 = vpop.f32.mrb[17].mxu1  ;;  %v1012_v24 = vsel %vm882_vm3, %v997_v20, 0.0 }
 0x146   : > { %v1219_v23 = vpop.f32.mrb[18].mxu0  ;;  %v1343_v26 = vadd.f32 %v1342_v22, %v1217_v19  ;;  %v1344_v13 = vpop.f32.mrb[18].mxu1  ;;  %v1013_v27 = vadd.f32 %v1012_v24, %v990_v16 }
 0x147   : > { %v1220_v18 = vpop.f32.mrb[19].mxu0  ;;  %v1355_v28 = vadd.f32 %v1350_v1, %v1341_v21  ;;  %v1345_v29 = vpop.f32.mrb[19].mxu1 }
 0x148   : > { %v1356_v31 = vadd.f32 %v1354_v56, %v1343_v26  ;;  %v1014_v32 = vrot.slane %v1013_v27, 4  ;;  %v2083_v34 = vpop.eup %2082 }
 0x149   : > { %v1621_v36 = vmul.f32 %v1355_v28, %v1355_v28  ;;  %v2085_v38 = vpop.eup %2084  ;;  %v999_v25 = vmul.f32 %v2083_v34, %v982_v3 }
 0x14a   : > { %v1622_v14 = vmul.f32 %v1356_v31, %v1356_v31  ;;  %v1006_v40 = vmul.f32 %v2085_v38, %v983_v4  ;;  %v1015_v42 = vadd.f32 %v1014_v32, %v1013_v27 }
 0x14b   : > { %v1001_v45 = vsel %vm1000_vm9, %v982_v3, %v999_v25 }
 0x14c   : > { %v1623_v44 = vadd.f32 %v1622_v14, %v1621_v36  ;;  %v1004_v47 = vsel %vm1002_vm10, %v1003_v41, %v1001_v45  ;;  %v1008_v48 = vsel %vm1007_vm11, %v983_v4, %v1006_v40  ;;  %v1016_v52 = vrot.slane %v1015_v42, 2 }
 0x14d   : > { %v1011_v50 = vsel %vm1009_vm12, %v1010_v46, %v1008_v48 }
 0x14e   : > { %2086 = vrsqrt.f32 %v1623_v44  ;;  %v1020_v53 = vsel %vm882_vm3, %v1011_v50, 0.0  ;;  %v1017_v58 = vadd.f32 %v1016_v52, %v1015_v42  ;;  %vm1626_vm13 = vcmp.eq.f32.partialorder %v1623_v44, inf }
 0x14f   : > { %v1021_v55 = vadd.f32 %v1020_v53, %v1004_v47  ;;  %v1629_v0 = vand.u32 2147483648, %v1623_v44  ;;  %vm1628_vm14 = vcmp.eq.f32.partialorder %v1623_v44, 0.0 }
 0x150   : > { %v1018_v59 = vrot.slane %v1017_v58, 1 }
 0x151   : > { %v1022_v57 = vrot.slane %v1021_v55, 4 }
 0x152   : > { %v1019_v33 = vadd.f32 %v1018_v59, %v1017_v58 }
 0x153   : > { %v1023_v30 = vadd.f32 %v1022_v57, %v1021_v55 }
 0x155   : > { %v1024_v35 = vrot.slane %v1023_v30, 2 }
 0x157   : > { %v1025_v61 = vadd.f32 %v1024_v35, %v1023_v30 }
 0x158   : > { %v2087_v60 = vpop.eup %2086 }
 0x159   : > { %v1625_v62 = vmul.f32 %v2087_v60, %v1623_v44  ;;  %v1026_v63 = vrot.slane %v1025_v61, 1 }
 0x15b   : > { %v1627_v8 = vsel %vm1626_vm13, %v1623_v44, %v1625_v62  ;;  %v1027_v2 = vadd.f32 %v1026_v63, %v1025_v61 }
 0x15c   : > { %v1630_v37 = vsel %vm1628_vm14, %v1629_v0, %v1627_v8 }
 0x15d   : > { %v1642_v3 = vrot.slane %v1630_v37, 1  ;;  %v1645_v4 = vadd.f32 %v1630_v37, %v1019_v33 }
 0x15f   : > { %v1646_v6 = vadd.f32 %v1642_v3, %v1027_v2 }
 0x164   : > { %v1478_v7 = vpop.f32.mrb[20].mxu0  ;;  %v1604_v10 = vpop.f32.mrb[20].mxu1 }
 0x165   : > { %v1480_v11 = vpop.f32.mrb[21].mxu0  ;;  %v1605_v12 = vadd.f32 %v1604_v10, %v1478_v7  ;;  %v1606_v15 = vpop.f32.mrb[21].mxu1 }
 0x166   : > { %v1482_v1 = vpop.f32.mrb[22].mxu0  ;;  %v1607_v16 = vadd.f32 %v1606_v15, %v1480_v11  ;;  %v1608_v17 = vpop.f32.mrb[22].mxu1 }
 0x167   : > { %v1483_v49 = vpop.f32.mrb[23].mxu0  ;;  %v1619_v19 = vadd.f32 %v1614_v54, %v1605_v12  ;;  %v1609_v56 = vpop.f32.mrb[23].mxu1 }
 0x168   : > { %v1620_v20 = vadd.f32 %v1618_v9, %v1607_v16 }
 0x169   : > { %v1631_v21 = vmul.f32 %v1619_v19, %v1619_v19 }
 0x16a   : > { %v1632_v22 = vmul.f32 %v1620_v20, %v1620_v20 }
 0x16c   : > { %v1633_v39 = vadd.f32 %v1632_v22, %v1631_v21 }
 0x16e   : > { %2088 = vrsqrt.f32 %v1633_v39  ;;  %vm1636_vm15 = vcmp.eq.f32.partialorder %v1633_v39, inf  ;;  %v1639_v24 = vand.u32 2147483648, %v1633_v39  ;;  %vm1638_vm1 = vcmp.eq.f32.partialorder %v1633_v39, 0.0 }
 0x178   : > { %v2089_v23 = vpop.eup %2088 }
 0x179   : > { %v1635_v43 = vmul.f32 %v2089_v23, %v1633_v39 }
 0x17b   : > { %v1637_v51 = vsel %vm1636_vm15, %v1633_v39, %v1635_v43 }
 0x17c   : > { %v1640_v26 = vsel %vm1638_vm1, %v1639_v24, %v1637_v51 }
 0x17d   : > { %v1648_v13 = vrot.slane %v1640_v26, 1  ;;  %v1651_v18 = vadd.f32 %v1645_v4, %v1640_v26 }
 0x17f   : > { %v1652_v27 = vadd.f32 %v1648_v13, %v1646_v6 }
 0x181   : > { %v1671_v28 = vrot.slane %v1652_v27, 7 }
 0x183   : > { %v1672_v29 = vsel %vm1097_vm0, %v1671_v28, %v1651_v18 }
 0x184   : > { %2009 = vmatmul.mubr.f32.vlgmr.msra.gmra.mrb[24].mxu0 %v1672_v29 }
 0x257   : > { %v1740_v31 = vpop.f32.mrb[24].mxu0 }
 0x258   : > { %1744 = vst [vmem:[%s220_s25] sm:$0x3] %v1740_v31  ;;  %v2010_v32 = vpop.f32.mrb[25].mxu0 }
 0x259   : > { %2103 = shalt.err (!%p2100_p3)
}
 0x25a   : > { %s2104_s13 = scalar_lea.hbm %s2792_s7, 32  ;;  %s2108_s16 = scalar_lea.hbm %s2837_s5, 64 }
 0x25b   : > { %p2105_p4 = scmp.ne.s32.totalorder %s2792_s7, %s2104_s13  ;;  %p2109_p9 = scmp.lt.u32.totalorder %s2792_s7, %s2837_s5 }
 0x25c   : > { %p2110_p10 = scmp.lt.u32.totalorder %s2108_s16, %s2104_s13  ;;  %p2112_p12 = scmp.lt.u32.totalorder %s2104_s13, %s2792_s7 }
 0x25d   : > { %p2106_p7 = pnand %p2105_p4, %p2227_p5 }
 0x25e   : > { %p2111_p11 = por %p2110_p10, %p2109_p9 }
 0x25f   : > { %p2107_p8 = pneg %p2106_p7 }
 0x260   : > { %p2113_p13 = por %p2112_p12, %p2111_p11 }
 0x262   : > { %p2114_p0 = pnand %p2113_p13, %p2107_p8 }
 0x264   : > { %2117 = shalt.err (!%p2114_p0)
}
 0x265   : > { %2035 = dma.vmem_to_hbm [thread:$0]  (%p2227_p5), %s2787_s30, 32, %s2792_s7, %s1746_s9  }
 0x266 PF: > { %p2041_p1 = scmp.ge.s32.totalorder %s2152_s21, 2  ;;  %s1771_s25 = sand.u32 1, %s2140_s18  }
 0x267   : > { %s1772_s26 = scalar_lea.sflag [#allocation3], %s1771_s25 }
 0x268   : > { %p2038_p2 = pnand %p2041_p1, %p2231_p6 }
 0x26a   : > { %2135 = dma.done.wait (!%p2038_p2), %s1772_s26, 32  }
 0x26b   : > { %2137 = vsyncadd (!%p2038_p2), %s1772_s26, 4294967264  ;;  %p15_p3 = scmp.ge.s32.totalorder %s2214_s24, 4   ;;  %s2841_s18 = smov %s2144_s19 }
 0x26c   : > { %s2842_s19 = smov %s2148_s20  ;;  %s2843_s20 = smov %s2225_s27 }
 0x26d   : > { %s2844_s21 = smov %s2214_s24  ;;  %17 = sbr.rel (!%p15_p3) target bundleno = 3 (0x3), region = 75 }
 0x274   :  { %1777 = vsyncpa [#allocation3], 1 }
 0x275   :  { %1779 = vsyncpa [#allocation3 + $0x1], 1 }

</bundles_post_ra>
